<compile_context>
chip_gen: v5e
topology: v5e:2x2
jax: 0.10.0
libtpu: 0.0.40
codegen_flags: <defaults>
</compile_context>

<pallas_src>
import functools

import jax
import jax.numpy as jnp
from jax.experimental import pallas as pl
from jax.experimental.pallas import tpu as pltpu


def attention_pool_kernel(x_ref, pos0_ref, posr_ref, sel_ref,
                          wq_ref, bq_ref, wk_ref, bk_ref, wv_ref, bv_ref,
                          wc_ref, bc_ref, o_ref, *, num_heads, matmul_dtype):
    # x_ref   : (BT, HW, C)  batch tile, token layout
    # pos0_ref: (1, C)       positional embedding of the pooled token (row 0)
    # posr_ref: (HW, C)      positional embeddings of the spatial tokens
    # sel_ref : (C, H)       0/1 head-selector: sel[c, h] = (c // head_dim == h)
    # wq/wk/wv_ref: (C, C)   transposed so y = x @ W + b   (matmul dtype)
    # wc_ref  : (C, F)       output projection (transposed, matmul dtype)
    # b*_ref  : (1, C)/(1, F) float32 biases
    # o_ref   : (BT, F)
    bt, hw, c = x_ref.shape
    head_dim = c // num_heads
    scale = head_dim ** -0.5
    f32 = jnp.float32

    x = x_ref[...].astype(f32)                         # (BT, HW, C)
    pos0 = pos0_ref[...]                               # (1, C)
    posr = posr_ref[...]                               # (HW, C)

    # Pooled-token input (query/key/value row 0) and spatial K/V inputs (f32).
    pooled = jnp.mean(x, axis=1) + pos0                # (BT, C)
    tok = (x + posr[None, :, :]).reshape(bt * hw, c)   # (BT*HW, C)

    pooled_c = pooled.astype(matmul_dtype)
    tok_c = tok.astype(matmul_dtype)
    wq = wq_ref[...]
    wk = wk_ref[...]
    wv = wv_ref[...]

    # Projections (MXU, f32 accumulation).  Q only for the pooled row.
    q0 = jnp.dot(pooled_c, wq, preferred_element_type=f32) + bq_ref[...]
    q0 = q0 * scale                                    # (BT, C)
    k0 = jnp.dot(pooled_c, wk, preferred_element_type=f32) + bk_ref[...]
    v0 = jnp.dot(pooled_c, wv, preferred_element_type=f32) + bv_ref[...]
    k = jnp.dot(tok_c, wk, preferred_element_type=f32) + bk_ref[...]   # (BT*HW, C)
    v = jnp.dot(tok_c, wv, preferred_element_type=f32) + bv_ref[...]   # (BT*HW, C)

    sel = sel_ref[...]                                 # (C, H), float32 0/1

    # Per-head scores for the pooled query against every position:
    #   s[b, l, h] = sum_d q0[b, h*D+d] * k[b, l, h*D+d]
    k3 = k.reshape(bt, hw, c)
    v3 = v.reshape(bt, hw, c)
    prod = (q0[:, None, :] * k3).reshape(bt * hw, c)                     # VPU
    s = jnp.dot(prod, sel, preferred_element_type=f32).reshape(bt, hw, num_heads)
    s0 = jnp.dot(q0 * k0, sel, preferred_element_type=f32)              # (BT, H)

    # Numerically stable softmax over L = HW + 1 positions, per (batch, head).
    m = jnp.maximum(jnp.max(s, axis=1), s0)            # (BT, H)
    p = jnp.exp(s - m[:, None, :])                     # (BT, HW, H)
    p0 = jnp.exp(s0 - m)                               # (BT, H)
    inv = pl.reciprocal(jnp.sum(p, axis=1) + p0, approx=True)   # (BT, H)
    pw = p * inv[:, None, :]
    p0w = p0 * inv

    # Broadcast per-head probabilities to all C lanes of their head and take
    # the probability-weighted sum over positions (VPU mul + sublane reduce).
    pfull = jax.lax.dot_general(
        pw.reshape(bt * hw, num_heads), sel, (((1,), (1,)), ((), ())),
        preferred_element_type=f32).reshape(bt, hw, c)
    p0full = jax.lax.dot_general(
        p0w, sel, (((1,), (1,)), ((), ())), preferred_element_type=f32)  # (BT, C)
    ctx = jnp.sum(pfull * v3, axis=1) + p0full * v0    # (BT, C)

    # Single output projection for the whole batch tile.
    out = jnp.dot(ctx.astype(matmul_dtype), wc_ref[...],
                  preferred_element_type=f32) + bc_ref[...]
    o_ref[...] = out.astype(o_ref.dtype)


def attention_pool_2d(x_nchw, params, num_heads, *, batch_tile=8,
                      matmul_dtype=jnp.bfloat16, vmem_limit_bytes=None):
    """Pallas implementation of AttentionPool2d.forward (returns x[0])."""
    n, c, h, w = x_nchw.shape
    hw = h * w
    assert c % num_heads == 0, "embed_dim must be divisible by num_heads"
    head_dim = c // num_heads
    f = params["wc"].shape[0]
    f32 = jnp.float32

    # Batch tile: keep it a multiple of 8 so the (BT, F) output block is
    # sublane-aligned; pad the batch up to a multiple of BT.
    bt = 8 * pl.cdiv(max(1, min(batch_tile, n)), 8)
    n_pad = pl.cdiv(n, bt) * bt

    # Glue / parameter setup in plain JAX (weights cast to matmul dtype once).
    x_tok = x_nchw.reshape(n, c, hw).transpose(0, 2, 1)          # (N, HW, C)
    if n_pad != n:
        x_tok = jnp.pad(x_tok, ((0, n_pad - n), (0, 0), (0, 0)))

    pos = params["pos"].astype(f32)                              # (HW+1, C)
    pos0 = pos[0:1]                                              # (1, C)
    posr = pos[1:]                                               # (HW, C)
    wq_t = params["wq"].T.astype(matmul_dtype)                   # (C, C)
    wk_t = params["wk"].T.astype(matmul_dtype)
    wv_t = params["wv"].T.astype(matmul_dtype)
    wc_t = params["wc"].T.astype(matmul_dtype)                   # (C, F)
    bq = params["bq"].reshape(1, c).astype(f32)
    bk = params["bk"].reshape(1, c).astype(f32)
    bv = params["bv"].reshape(1, c).astype(f32)
    bc = params["bc"].reshape(1, f).astype(f32)

    # 0/1 head-selector matrix: sel[c_idx, h] = (c_idx // head_dim == h).
    sel = (jnp.arange(c)[:, None] // head_dim ==
           jnp.arange(num_heads)[None, :]).astype(f32)           # (C, H)

    kernel = functools.partial(attention_pool_kernel,
                               num_heads=num_heads,
                               matmul_dtype=matmul_dtype)

    def const2(b):
        return (0, 0)

    out = pl.pallas_call(
        kernel,
        out_shape=jax.ShapeDtypeStruct((n_pad, f), x_nchw.dtype),
        grid_spec=pltpu.PrefetchScalarGridSpec(
            num_scalar_prefetch=0,
            grid=(n_pad // bt,),
            in_specs=[
                pl.BlockSpec((bt, hw, c), lambda b: (b, 0, 0)),  # x tokens
                pl.BlockSpec((1, c), const2),                    # pos row 0
                pl.BlockSpec((hw, c), const2),                   # pos rows 1..
                pl.BlockSpec((c, num_heads), const2),            # head selector
                pl.BlockSpec((c, c), const2),                    # Wq^T
                pl.BlockSpec((1, c), const2),                    # bq
                pl.BlockSpec((c, c), const2),                    # Wk^T
                pl.BlockSpec((1, c), const2),                    # bk
                pl.BlockSpec((c, c), const2),                    # Wv^T
                pl.BlockSpec((1, c), const2),                    # bv
                pl.BlockSpec((c, f), const2),                    # Wc^T
                pl.BlockSpec((1, f), const2),                    # bc
            ],
            out_specs=pl.BlockSpec((bt, f), lambda b: (b, 0)),
        ),
        compiler_params=pltpu.CompilerParams(
            dimension_semantics=("parallel",),
            vmem_limit_bytes=vmem_limit_bytes),
    )(x_tok, pos0, posr, sel, wq_t, bq, wk_t, bk, wv_t, bv, wc_t, bc)
    return out[:n]


def attention_pool_2d_reference(x_nchw, params, num_heads):
    """Pure-JAX (f32) reference mirroring the PyTorch forward exactly."""
    n, c, h, w = x_nchw.shape
    x = x_nchw.reshape(n, c, h * w).transpose(2, 0, 1)            # (HW, N, C)
    x = jnp.concatenate([x.mean(axis=0, keepdims=True), x], 0)    # (L, N, C)
    x = x + params["pos"][:, None, :]
    L = x.shape[0]
    head_dim = c // num_heads
    scale = head_dim ** -0.5

    q = x @ params["wq"].T + params["bq"]
    k = x @ params["wk"].T + params["bk"]
    v = x @ params["wv"].T + params["bv"]
    q = q.reshape(L, n, num_heads, head_dim) * scale
    k = k.reshape(L, n, num_heads, head_dim)
    v = v.reshape(L, n, num_heads, head_dim)
    s = jnp.einsum("lnhd,mnhd->nhlm", q, k)
    p = jax.nn.softmax(s, axis=-1)
    o = jnp.einsum("nhlm,mnhd->lnhd", p, v).reshape(L, n, c)
    out = o @ params["wc"].T + params["bc"]                       # (L, N, F)
    return out[0]                                                 # (N, F)


if __name__ == "__main__":
    N, C, H, W = 16, 32, 4, 4       # batch, embed_dim (channels), spatial
    NUM_HEADS = 4
    FEATURE_DIM = 16
    SPACIAL = H * W + 1             # positional embedding rows = HW + 1

    key = jax.random.PRNGKey(0)
    ks = jax.random.split(key, 10)
    params = {
        "pos": jax.random.normal(ks[0], (SPACIAL, C), jnp.float32) / (C ** 0.5),
        "wq": jax.random.normal(ks[1], (C, C), jnp.float32) / (C ** 0.5),
        "bq": jax.random.normal(ks[2], (C,), jnp.float32) * 0.02,
        "wk": jax.random.normal(ks[3], (C, C), jnp.float32) / (C ** 0.5),
        "bk": jax.random.normal(ks[4], (C,), jnp.float32) * 0.02,
        "wv": jax.random.normal(ks[5], (C, C), jnp.float32) / (C ** 0.5),
        "bv": jax.random.normal(ks[6], (C,), jnp.float32) * 0.02,
        "wc": jax.random.normal(ks[7], (FEATURE_DIM, C), jnp.float32) / (C ** 0.5),
        "bc": jax.random.normal(ks[8], (FEATURE_DIM,), jnp.float32) * 0.02,
    }
    x = jax.random.normal(ks[9], (N, C, H, W), jnp.float32)

    # batch_tile=8 -> grid of 2 "parallel" steps (keeps both v7x cores busy).
    out = attention_pool_2d(x, params, NUM_HEADS, batch_tile=8)
    out = jax.block_until_ready(out)

    ref = attention_pool_2d_reference(x, params, NUM_HEADS)
    assert out.shape == (N, FEATURE_DIM), out.shape
    # bf16 MXU operands (f32 accumulation) -> ~1e-2-level deviations vs f32 ref.
    if not bool(jnp.allclose(out, ref, atol=3e-2, rtol=3e-2)):
        raise AssertionError(
            f"mismatch: max abs err = {float(jnp.max(jnp.abs(out - ref)))}")
    print("KERNEL_OK")
</pallas_src>

<mosaic_0001>
module attributes {stable_mosaic.version = 11 : i64} {
  func.func @attention_pool_kernel(%arg0: i32, %arg1: memref<8x16x32xf32, #tpu.memory_space<vmem>>, %arg2: memref<1x32xf32, #tpu.memory_space<vmem>>, %arg3: memref<16x32xf32, #tpu.memory_space<vmem>>, %arg4: memref<32x4xf32, #tpu.memory_space<vmem>>, %arg5: memref<32x32xbf16, #tpu.memory_space<vmem>>, %arg6: memref<1x32xf32, #tpu.memory_space<vmem>>, %arg7: memref<32x32xbf16, #tpu.memory_space<vmem>>, %arg8: memref<1x32xf32, #tpu.memory_space<vmem>>, %arg9: memref<32x32xbf16, #tpu.memory_space<vmem>>, %arg10: memref<1x32xf32, #tpu.memory_space<vmem>>, %arg11: memref<32x16xbf16, #tpu.memory_space<vmem>>, %arg12: memref<1x16xf32, #tpu.memory_space<vmem>>, %arg13: memref<8x16xf32, #tpu.memory_space<vmem>>) attributes {dimension_semantics = [#tpu.dimension_semantics<parallel>], iteration_bounds = array<i64: 2>, scalar_prefetch = 0 : i64, scratch_operands = 0 : i64, tpu.core_type = #tpu.core_type<tc>, window_params = [{transform_indices = @transform_0, window_bounds = array<i64: 8, 16, 32>}, {pipeline_mode = #tpu.pipeline_mode<synchronous>, transform_indices = @transform_1, window_bounds = array<i64: 1, 32>}, {pipeline_mode = #tpu.pipeline_mode<synchronous>, transform_indices = @transform_2, window_bounds = array<i64: 16, 32>}, {pipeline_mode = #tpu.pipeline_mode<synchronous>, transform_indices = @transform_3, window_bounds = array<i64: 32, 4>}, {pipeline_mode = #tpu.pipeline_mode<synchronous>, transform_indices = @transform_4, window_bounds = array<i64: 32, 32>}, {pipeline_mode = #tpu.pipeline_mode<synchronous>, transform_indices = @transform_5, window_bounds = array<i64: 1, 32>}, {pipeline_mode = #tpu.pipeline_mode<synchronous>, transform_indices = @transform_6, window_bounds = array<i64: 32, 32>}, {pipeline_mode = #tpu.pipeline_mode<synchronous>, transform_indices = @transform_7, window_bounds = array<i64: 1, 32>}, {pipeline_mode = #tpu.pipeline_mode<synchronous>, transform_indices = @transform_8, window_bounds = array<i64: 32, 32>}, {pipeline_mode = #tpu.pipeline_mode<synchronous>, transform_indices = @transform_9, window_bounds = array<i64: 1, 32>}, {pipeline_mode = #tpu.pipeline_mode<synchronous>, transform_indices = @transform_10, window_bounds = array<i64: 32, 16>}, {pipeline_mode = #tpu.pipeline_mode<synchronous>, transform_indices = @transform_11, window_bounds = array<i64: 1, 16>}, {transform_indices = @transform_12, window_bounds = array<i64: 8, 16>}]} {
    %c0 = arith.constant 0 : index
    %c0_0 = arith.constant 0 : index
    %c0_1 = arith.constant 0 : index
    %0 = vector.load %arg1[%c0, %c0_0, %c0_1] : memref<8x16x32xf32, #tpu.memory_space<vmem>>, vector<8x16x32xf32>
    %c0_2 = arith.constant 0 : index
    %c0_3 = arith.constant 0 : index
    %1 = vector.load %arg2[%c0_2, %c0_3] : memref<1x32xf32, #tpu.memory_space<vmem>>, vector<1x32xf32>
    %c0_4 = arith.constant 0 : index
    %c0_5 = arith.constant 0 : index
    %2 = vector.load %arg3[%c0_4, %c0_5] : memref<16x32xf32, #tpu.memory_space<vmem>>, vector<16x32xf32>
    %cst = arith.constant dense<0.000000e+00> : vector<8x32xf32>
    %3 = vector.multi_reduction <add>, %0, %cst [1] : vector<8x16x32xf32> to vector<8x32xf32>
    %cst_6 = arith.constant 1.600000e+01 : f32
    %4 = vector.broadcast %cst_6 : f32 to vector<8x32xf32>
    %5 = arith.divf %3, %4 : vector<8x32xf32>
    %6 = vector.broadcast %1 : vector<1x32xf32> to vector<8x32xf32>
    %7 = arith.addf %5, %6 : vector<8x32xf32>
    %8 = vector.shape_cast %2 : vector<16x32xf32> to vector<1x16x32xf32>
    %9 = vector.broadcast %8 : vector<1x16x32xf32> to vector<8x16x32xf32>
    %10 = arith.addf %0, %9 : vector<8x16x32xf32>
    %11 = vector.shape_cast %10 : vector<8x16x32xf32> to vector<128x32xf32>
    %12 = arith.truncf %7 : vector<8x32xf32> to vector<8x32xbf16>
    %13 = arith.truncf %11 : vector<128x32xf32> to vector<128x32xbf16>
    %c0_7 = arith.constant 0 : index
    %c0_8 = arith.constant 0 : index
    %14 = vector.load %arg5[%c0_7, %c0_8] : memref<32x32xbf16, #tpu.memory_space<vmem>>, vector<32x32xbf16>
    %c0_9 = arith.constant 0 : index
    %c0_10 = arith.constant 0 : index
    %15 = vector.load %arg7[%c0_9, %c0_10] : memref<32x32xbf16, #tpu.memory_space<vmem>>, vector<32x32xbf16>
    %c0_11 = arith.constant 0 : index
    %c0_12 = arith.constant 0 : index
    %16 = vector.load %arg9[%c0_11, %c0_12] : memref<32x32xbf16, #tpu.memory_space<vmem>>, vector<32x32xbf16>
    %cst_13 = arith.constant dense<0.000000e+00> : vector<8x32xf32>
    %17 = tpu.matmul %12, %14, %cst_13 {dimension_numbers = #tpu.dot_dimension_numbers<[1], [0], [0], [1], [0, 0, 1, 1], [], []>} : vector<8x32xbf16>, vector<32x32xbf16>, vector<8x32xf32> -> vector<8x32xf32>
    %c0_14 = arith.constant 0 : index
    %c0_15 = arith.constant 0 : index
    %18 = vector.load %arg6[%c0_14, %c0_15] : memref<1x32xf32, #tpu.memory_space<vmem>>, vector<1x32xf32>
    %19 = vector.broadcast %18 : vector<1x32xf32> to vector<8x32xf32>
    %20 = arith.addf %17, %19 : vector<8x32xf32>
    %cst_16 = arith.constant 0.353553385 : f32
    %21 = vector.broadcast %cst_16 : f32 to vector<8x32xf32>
    %22 = arith.mulf %20, %21 : vector<8x32xf32>
    %cst_17 = arith.constant dense<0.000000e+00> : vector<8x32xf32>
    %23 = tpu.matmul %12, %15, %cst_17 {dimension_numbers = #tpu.dot_dimension_numbers<[1], [0], [0], [1], [0, 0, 1, 1], [], []>} : vector<8x32xbf16>, vector<32x32xbf16>, vector<8x32xf32> -> vector<8x32xf32>
    %c0_18 = arith.constant 0 : index
    %c0_19 = arith.constant 0 : index
    %24 = vector.load %arg8[%c0_18, %c0_19] : memref<1x32xf32, #tpu.memory_space<vmem>>, vector<1x32xf32>
    %25 = vector.broadcast %24 : vector<1x32xf32> to vector<8x32xf32>
    %26 = arith.addf %23, %25 : vector<8x32xf32>
    %cst_20 = arith.constant dense<0.000000e+00> : vector<8x32xf32>
    %27 = tpu.matmul %12, %16, %cst_20 {dimension_numbers = #tpu.dot_dimension_numbers<[1], [0], [0], [1], [0, 0, 1, 1], [], []>} : vector<8x32xbf16>, vector<32x32xbf16>, vector<8x32xf32> -> vector<8x32xf32>
    %c0_21 = arith.constant 0 : index
    %c0_22 = arith.constant 0 : index
    %28 = vector.load %arg10[%c0_21, %c0_22] : memref<1x32xf32, #tpu.memory_space<vmem>>, vector<1x32xf32>
    %29 = vector.broadcast %28 : vector<1x32xf32> to vector<8x32xf32>
    %30 = arith.addf %27, %29 : vector<8x32xf32>
    %cst_23 = arith.constant dense<0.000000e+00> : vector<128x32xf32>
    %31 = tpu.matmul %13, %15, %cst_23 {dimension_numbers = #tpu.dot_dimension_numbers<[1], [0], [0], [1], [0, 0, 1, 1], [], []>} : vector<128x32xbf16>, vector<32x32xbf16>, vector<128x32xf32> -> vector<128x32xf32>
    %c0_24 = arith.constant 0 : index
    %c0_25 = arith.constant 0 : index
    %32 = vector.load %arg8[%c0_24, %c0_25] : memref<1x32xf32, #tpu.memory_space<vmem>>, vector<1x32xf32>
    %33 = vector.broadcast %32 : vector<1x32xf32> to vector<128x32xf32>
    %34 = arith.addf %31, %33 : vector<128x32xf32>
    %cst_26 = arith.constant dense<0.000000e+00> : vector<128x32xf32>
    %35 = tpu.matmul %13, %16, %cst_26 {dimension_numbers = #tpu.dot_dimension_numbers<[1], [0], [0], [1], [0, 0, 1, 1], [], []>} : vector<128x32xbf16>, vector<32x32xbf16>, vector<128x32xf32> -> vector<128x32xf32>
    %c0_27 = arith.constant 0 : index
    %c0_28 = arith.constant 0 : index
    %36 = vector.load %arg10[%c0_27, %c0_28] : memref<1x32xf32, #tpu.memory_space<vmem>>, vector<1x32xf32>
    %37 = vector.broadcast %36 : vector<1x32xf32> to vector<128x32xf32>
    %38 = arith.addf %35, %37 : vector<128x32xf32>
    %c0_29 = arith.constant 0 : index
    %c0_30 = arith.constant 0 : index
    %39 = vector.load %arg4[%c0_29, %c0_30] : memref<32x4xf32, #tpu.memory_space<vmem>>, vector<32x4xf32>
    %40 = vector.shape_cast %34 : vector<128x32xf32> to vector<8x16x32xf32>
    %41 = vector.shape_cast %38 : vector<128x32xf32> to vector<8x16x32xf32>
    %42 = vector.shape_cast %22 : vector<8x32xf32> to vector<8x1x32xf32>
    %43 = vector.broadcast %42 : vector<8x1x32xf32> to vector<8x16x32xf32>
    %44 = arith.mulf %43, %40 : vector<8x16x32xf32>
    %45 = vector.shape_cast %44 : vector<8x16x32xf32> to vector<128x32xf32>
    %cst_31 = arith.constant dense<0.000000e+00> : vector<128x4xf32>
    %46 = tpu.matmul %45, %39, %cst_31 {dimension_numbers = #tpu.dot_dimension_numbers<[1], [0], [0], [1], [0, 0, 1, 1], [], []>} : vector<128x32xf32>, vector<32x4xf32>, vector<128x4xf32> -> vector<128x4xf32>
    %47 = vector.shape_cast %46 : vector<128x4xf32> to vector<8x16x4xf32>
    %48 = arith.mulf %22, %26 : vector<8x32xf32>
    %cst_32 = arith.constant dense<0.000000e+00> : vector<8x4xf32>
    %49 = tpu.matmul %48, %39, %cst_32 {dimension_numbers = #tpu.dot_dimension_numbers<[1], [0], [0], [1], [0, 0, 1, 1], [], []>} : vector<8x32xf32>, vector<32x4xf32>, vector<8x4xf32> -> vector<8x4xf32>
    %cst_33 = arith.constant dense<0xFF800000> : vector<8x4xf32>
    %50 = vector.multi_reduction <maximumf>, %47, %cst_33 [1] : vector<8x16x4xf32> to vector<8x4xf32>
    %51 = arith.maximumf %50, %49 : vector<8x4xf32>
    %52 = vector.shape_cast %51 : vector<8x4xf32> to vector<8x1x4xf32>
    %53 = vector.broadcast %52 : vector<8x1x4xf32> to vector<8x16x4xf32>
    %54 = arith.subf %47, %53 : vector<8x16x4xf32>
    %55 = math.exp %54 : vector<8x16x4xf32>
    %56 = arith.subf %49, %51 : vector<8x4xf32>
    %57 = math.exp %56 : vector<8x4xf32>
    %cst_34 = arith.constant dense<0.000000e+00> : vector<8x4xf32>
    %58 = vector.multi_reduction <add>, %55, %cst_34 [1] : vector<8x16x4xf32> to vector<8x4xf32>
    %59 = arith.addf %58, %57 : vector<8x4xf32>
    %60 = tpu.reciprocal %59 {approx = true} : vector<8x4xf32> -> vector<8x4xf32>
    %61 = vector.shape_cast %60 : vector<8x4xf32> to vector<8x1x4xf32>
    %62 = vector.broadcast %61 : vector<8x1x4xf32> to vector<8x16x4xf32>
    %63 = arith.mulf %55, %62 : vector<8x16x4xf32>
    %64 = arith.mulf %57, %60 : vector<8x4xf32>
    %65 = vector.shape_cast %63 : vector<8x16x4xf32> to vector<128x4xf32>
    %cst_35 = arith.constant dense<0.000000e+00> : vector<128x32xf32>
    %66 = tpu.matmul %65, %39, %cst_35 {dimension_numbers = #tpu.dot_dimension_numbers<[1], [1], [0], [0], [0, 0, 1, 0], [], []>} : vector<128x4xf32>, vector<32x4xf32>, vector<128x32xf32> -> vector<128x32xf32>
    %67 = vector.shape_cast %66 : vector<128x32xf32> to vector<8x16x32xf32>
    %cst_36 = arith.constant dense<0.000000e+00> : vector<8x32xf32>
    %68 = tpu.matmul %64, %39, %cst_36 {dimension_numbers = #tpu.dot_dimension_numbers<[1], [1], [0], [0], [0, 0, 1, 0], [], []>} : vector<8x4xf32>, vector<32x4xf32>, vector<8x32xf32> -> vector<8x32xf32>
    %69 = arith.mulf %67, %41 : vector<8x16x32xf32>
    %cst_37 = arith.constant dense<0.000000e+00> : vector<8x32xf32>
    %70 = vector.multi_reduction <add>, %69, %cst_37 [1] : vector<8x16x32xf32> to vector<8x32xf32>
    %71 = arith.mulf %68, %30 : vector<8x32xf32>
    %72 = arith.addf %70, %71 : vector<8x32xf32>
    %73 = arith.truncf %72 : vector<8x32xf32> to vector<8x32xbf16>
    %c0_38 = arith.constant 0 : index
    %c0_39 = arith.constant 0 : index
    %74 = vector.load %arg11[%c0_38, %c0_39] : memref<32x16xbf16, #tpu.memory_space<vmem>>, vector<32x16xbf16>
    %cst_40 = arith.constant dense<0.000000e+00> : vector<8x16xf32>
    %75 = tpu.matmul %73, %74, %cst_40 {dimension_numbers = #tpu.dot_dimension_numbers<[1], [0], [0], [1], [0, 0, 1, 1], [], []>} : vector<8x32xbf16>, vector<32x16xbf16>, vector<8x16xf32> -> vector<8x16xf32>
    %c0_41 = arith.constant 0 : index
    %c0_42 = arith.constant 0 : index
    %76 = vector.load %arg12[%c0_41, %c0_42] : memref<1x16xf32, #tpu.memory_space<vmem>>, vector<1x16xf32>
    %77 = vector.broadcast %76 : vector<1x16xf32> to vector<8x16xf32>
    %78 = arith.addf %75, %77 : vector<8x16xf32>
    %c0_43 = arith.constant 0 : index
    %c0_44 = arith.constant 0 : index
    %79 = vector.load %arg13[%c0_43, %c0_44] : memref<8x16xf32, #tpu.memory_space<vmem>>, vector<8x16xf32>
    tpu.vector_store %arg13[%c0_43, %c0_44], %78 {strides = array<i32>} : memref<8x16xf32, #tpu.memory_space<vmem>>, vector<8x16xf32>,
    return
  }
  func.func @transform_0(%arg0: i32) -> (i32, i32, i32) {
    %c0_i32 = arith.constant 0 : i32
    %c0_i32_0 = arith.constant 0 : i32
    %c0_i32_1 = arith.constant 0 : i32
    return %arg0, %c0_i32, %c0_i32_0 : i32, i32, i32
  }
  func.func @transform_1(%arg0: i32) -> (i32, i32) {
    %c0_i32 = arith.constant 0 : i32
    %c0_i32_0 = arith.constant 0 : i32
    %c0_i32_1 = arith.constant 0 : i32
    return %c0_i32, %c0_i32_0 : i32, i32
  }
  func.func @transform_2(%arg0: i32) -> (i32, i32) {
    %c0_i32 = arith.constant 0 : i32
    %c0_i32_0 = arith.constant 0 : i32
    %c0_i32_1 = arith.constant 0 : i32
    return %c0_i32, %c0_i32_0 : i32, i32
  }
  func.func @transform_3(%arg0: i32) -> (i32, i32) {
    %c0_i32 = arith.constant 0 : i32
    %c0_i32_0 = arith.constant 0 : i32
    %c0_i32_1 = arith.constant 0 : i32
    return %c0_i32, %c0_i32_0 : i32, i32
  }
  func.func @transform_4(%arg0: i32) -> (i32, i32) {
    %c0_i32 = arith.constant 0 : i32
    %c0_i32_0 = arith.constant 0 : i32
    %c0_i32_1 = arith.constant 0 : i32
    return %c0_i32, %c0_i32_0 : i32, i32
  }
  func.func @transform_5(%arg0: i32) -> (i32, i32) {
    %c0_i32 = arith.constant 0 : i32
    %c0_i32_0 = arith.constant 0 : i32
    %c0_i32_1 = arith.constant 0 : i32
    return %c0_i32, %c0_i32_0 : i32, i32
  }
  func.func @transform_6(%arg0: i32) -> (i32, i32) {
    %c0_i32 = arith.constant 0 : i32
    %c0_i32_0 = arith.constant 0 : i32
    %c0_i32_1 = arith.constant 0 : i32
    return %c0_i32, %c0_i32_0 : i32, i32
  }
  func.func @transform_7(%arg0: i32) -> (i32, i32) {
    %c0_i32 = arith.constant 0 : i32
    %c0_i32_0 = arith.constant 0 : i32
    %c0_i32_1 = arith.constant 0 : i32
    return %c0_i32, %c0_i32_0 : i32, i32
  }
  func.func @transform_8(%arg0: i32) -> (i32, i32) {
    %c0_i32 = arith.constant 0 : i32
    %c0_i32_0 = arith.constant 0 : i32
    %c0_i32_1 = arith.constant 0 : i32
    return %c0_i32, %c0_i32_0 : i32, i32
  }
  func.func @transform_9(%arg0: i32) -> (i32, i32) {
    %c0_i32 = arith.constant 0 : i32
    %c0_i32_0 = arith.constant 0 : i32
    %c0_i32_1 = arith.constant 0 : i32
    return %c0_i32, %c0_i32_0 : i32, i32
  }
  func.func @transform_10(%arg0: i32) -> (i32, i32) {
    %c0_i32 = arith.constant 0 : i32
    %c0_i32_0 = arith.constant 0 : i32
    %c0_i32_1 = arith.constant 0 : i32
    return %c0_i32, %c0_i32_0 : i32, i32
  }
  func.func @transform_11(%arg0: i32) -> (i32, i32) {
    %c0_i32 = arith.constant 0 : i32
    %c0_i32_0 = arith.constant 0 : i32
    %c0_i32_1 = arith.constant 0 : i32
    return %c0_i32, %c0_i32_0 : i32, i32
  }
  func.func @transform_12(%arg0: i32) -> (i32, i32) {
    %c0_i32 = arith.constant 0 : i32
    %c0_i32_0 = arith.constant 0 : i32
    return %arg0, %c0_i32 : i32, i32
  }
}

</mosaic_0001>

<bundles_post_ra>
// kernel: tpu_custom_call.1
= control target key start
LH: loop header
LB: loop body
LE: loop exit
PB: predicated region body
PF: predicated region fallthrough
CT: control target
= control target key end

     0   :  { %s2958_s0 = inlined_call_operand.hbm [shape: f32[16,16,32], index: 0, kind: input, shape index: {}]   ;;  %s2959_s1 = inlined_call_operand.vmem [shape: f32[1,32], index: 1, kind: input, shape index: {}]   ;;  %s2960_s2 = inlined_call_operand.vmem [shape: f32[16,32], index: 2, kind: input, shape index: {}]   ;;  %s2961_s3 = inlined_call_operand.vmem [shape: f32[32,4], index: 3, kind: input, shape index: {}]   ;;  %s2962_s4 = inlined_call_operand.vmem [shape: bf16[32,32], index: 4, kind: input, shape index: {}]   ;;  %s2963_s5 = inlined_call_operand.vmem [shape: f32[1,32], index: 5, kind: input, shape index: {}]   ;;  %s2964_s6 = inlined_call_operand.vmem [shape: bf16[32,32], index: 6, kind: input, shape index: {}]   ;;  %s2965_s7 = inlined_call_operand.vmem [shape: f32[1,32], index: 7, kind: input, shape index: {}]   ;;  %s2966_s8 = inlined_call_operand.hbm [shape: bf16[32,32], index: 8, kind: input, shape index: {}]   ;;  %s2967_s9 = inlined_call_operand.vmem [shape: f32[1,32], index: 9, kind: input, shape index: {}]   ;;  %s2968_s10 = inlined_call_operand.vmem [shape: bf16[32,16], index: 10, kind: input, shape index: {}]   ;;  %s2969_s11 = inlined_call_operand.vmem [shape: f32[1,16], index: 11, kind: input, shape index: {}]   ;;  %s2970_s12 = inlined_call_operand.hbm [shape: f32[16,16], index: 12, kind: output, shape index: {}]  }
   0x1   :  { %2976 = sst [smem:[#allocation17_spill]] %s2966_s8 }
   0x2   :  { %17 = vsyncpa [#allocation3], 0 }
   0x3   :  { %19 = vsyncpa [#allocation3 + $0x1], 0 }
   0x4   :  { %20 = vsyncpa [#allocation6], 0 }
   0x5   :  { %21 = vsyncpa [#allocation4], 0 }
   0x6   :  { %23 = vsyncpa [#allocation4 + $0x1], 0  ;;  %s2255_s21 = smov 0   ;;  %s2257_s22 = smov 0  }
   0x7   :  { %s2259_s23 = smov 0   ;;  %s2261_s24 = smov 0  }
   0x8 LB: > { %2977 = sst [smem:[#allocation11_spill]] %s2170_s21  ;;  %s2276_s25 = sadd.s32 4294967295, %s2182_s24   ;;  %s2182_s24 = sphi %s2261_s24, %s2993_s24   ;;  %s2178_s23 = sphi %s2259_s23, %s2995_s23   ;;  %s2174_s22 = sphi %s2257_s22, %s2997_s22   ;;  %s2170_s21 = sphi %s2255_s21, %s2996_s21  }
   0x9   : > { %2978 = sst [smem:[#allocation12_spill]] %s2178_s23  ;;  %s1813_s26 = sadd.s32 4294967294, %s2182_s24  }
   0xa   : > { %p49_p0 = scmp.ne.s32.totalorder %s2174_s22, %s2170_s21  ;;  %p50_p1 = scmp.eq.s32.totalorder %s2276_s25, 0 }
   0xb   : > { %p304_p2 = scmp.eq.s32.totalorder %s2276_s25, 1  ;;  %p310_p3 = scmp.eq.s32.totalorder %s1813_s26, 1 }
   0xc   : > { %p2285_p4 = por %p50_p1, %p49_p0  ;;  %p1814_p5 = scmp.ge.s32.totalorder %s2182_s24, 1 }
   0xd   : > { %p2290_p6 = por %p310_p3, %p49_p0  ;;  %p317_p7 = scmp.lt.s32.totalorder %s2182_s24, 3 }
   0xe   : > { %s2982_s8 = sld [smem:[#allocation17_spill]]  ;;  %s2184_s15 = smov [#allocation5]  }
   0xf   : > { %s2980_s28 = scalar_select %p2290_p6, 1, 0 }
  0x10   : > { %p2298_p8 = pnand %p1814_p5, %p317_p7  ;;  %s351_s16 = sshll.u32 %s2184_s15, 4  ;;  %s352_s16 = int_to_ptr.vmem [resolvable:$true] %s351_s16 }
  0x11   : > { %2981 = sst [smem:[#allocation13_spill]] %s2980_s28  ;;  %s2308_s17 = sadd.s32 1, %s2182_s24  }
  0x12   : > { %p1941_p9 = pneg %p2298_p8  ;;  %2984 = sst [smem:[#allocation14_spill]] %s2308_s17 }
  0x13   : > { %s2185_s18 = smov 64   ;;  %s2186_s19 = smov 4  }
  0x14   : > { %s349_s13 = sshll.u32 %s2982_s8, 4  ;;  %p1942_p10 = pnand %p1941_p9, %p50_p1  ;;  %s350_s13 = int_to_ptr.hbm [resolvable:$true] %s349_s13 }
  0x15   : > { %s33_s20 = ssub.s32 %s2182_s24, %s2308_s17  ;;  %s36_s26 = sadd.s32 1, %s2178_s23 }
  0x16   : > { %1944 = dma.hbm_to_vmem [thread:$0]  (!%p1942_p10), %s350_s13, 256, %s352_s16, [#allocation6], %s2185_s18, %s2185_s18, %s2186_s19  }
  0x17   : > { %p34_p12 = scmp.eq.s32.totalorder %s33_s20, 0  ;;  %p43_p13 = scmp.ne.s32.totalorder %s2178_s23, %s2174_s22 }
  0x18   : > { %p44_p0 = scmp.eq.s32.totalorder %s2182_s24, 0  ;;  %p1954_p3 = scmp.lt.s32.totalorder %s2182_s24, 2 }
  0x19   : > { %s2318_s29 = scalar_select %p34_p12, %s2178_s23, %s36_s26  }
  0x1a   : > { %p45_p5 = por %p44_p0, %p43_p13  ;;  %p2322_p7 = por %p304_p2, %p43_p13 }
  0x1b   : > { %2985 = sst [smem:[#allocation15_spill]] %s2318_s29  ;;  %s374_s15 = sand.u32 1, %s2178_s23  }
  0x1c   : > { %s1924_s8 = sshll.u32 %s2182_s24, 7  ;;  %s1817_s28 = sshll.u32 %s374_s15, 7 }
  0x1d   : > { %s384_s16 = scalar_lea.hbm %s2958_s0, %s1924_s8  ;;  %s378_s19 = scalar_lea.vmem [#allocation2], %s1817_s28 }
  0x1e   : > { %s385_s18 = sshll.u32 %s384_s16, 4  ;;  %s387_s20 = sshll.u32 %s378_s19, 4  ;;  %s386_s18 = int_to_ptr.hbm [resolvable:$true] %s385_s18  ;;  %s388_s20 = int_to_ptr.vmem [resolvable:$true] %s387_s20 }
  0x1f   : > { %p2333_p9 = pnand %p1954_p3, %p45_p5  ;;  %s375_s29 = scalar_lea.sflag [#allocation3], %s374_s15 }
  0x20   : > { %s2082_s17 = sshra.s32 %s386_s18, 4  ;;  %s2089_s28 = scalar_lea.hbm %s2958_s0, 256  ;;  %s2083_s17 = int_to_ptr.hbm [resolvable:$true] %s2082_s17 }
  0x21   : > { %s2084_s23 = scalar_lea.hbm %s2083_s17, 128  ;;  %p2086_p10 = pneg %p2333_p9 }
  0x22   : > { %p2085_p2 = scmp.ne.s32.totalorder %s2083_s17, %s2084_s23  ;;  %p2090_p0 = scmp.lt.s32.totalorder %s2083_s17, %s2958_s0 }
  0x23   : > { %p2091_p3 = scmp.lt.s32.totalorder %s2089_s28, %s2084_s23 }
  0x24   : > { %p2087_p12 = pnand %p2086_p10, %p2085_p2 }
  0x25   : > { %p2092_p5 = por %p2091_p3, %p2090_p0 }
  0x26   : > { %p2088_p13 = pneg %p2087_p12 }
  0x28   : > { %p2093_p11 = pnand %p2092_p5, %p2088_p13 }
  0x2a   : > { %2096 = shalt.err (!%p2093_p11)
}
  0x2b   : > { %s2187_s15 = smov 128   ;;  %s2188_s19 = smov 8  }
  0x2c   : > { %1948 = dma.hbm_to_vmem [thread:$0]  (!%p2333_p9), %s386_s18, 2048, %s388_s20, %s375_s29, %s2187_s15, %s2187_s15, %s2188_s19  }
  0x2d   : > { %399 = sbr.rel (%p2298_p8) target bundleno = 945 (0x3b1), region = 68 }
  0x32   : > { %s2350_s8 = sand.u32 1, %s2174_s22  }
  0x33   : > { %s1822_s21 = sshll.u32 %s2350_s8, 7  ;;  %s402_s17 = scalar_lea.sflag [#allocation3], %s2350_s8 }
  0x34   : > { %s2354_s23 = scalar_lea.vmem [#allocation2], %s1822_s21 }
  0x35   : > { %2157 = dma.done.wait (%p2285_p4), %s402_s17, 2048  }
  0x36   : > { %2159 = vsyncadd (%p2285_p4), %s402_s17, 4294965248 }
  0x37   : > { %2161 = dma.done.wait (%p50_p1), [#allocation6], 256  }
  0x38   : > { %2163 = vsyncadd (%p50_p1), [#allocation6], 4294967040  ;;  %v2189_v0 = vmov 16.0   ;;  %v1928_v2 = vld [vmem:[%s2964_s6 + $0x8] sm:$0xff]  ;;  %v454_v3 = vld [vmem:[%s2354_s23] sm:$0xff]  ;;  %vm473_vm0 = vcmask 261120  }
  0x39   : > { %2000 = vrcp.f32 %v2189_v0  ;;  %v455_v4 = vld [vmem:[%s2354_s23 + $0x8] sm:$0xff]  ;;  %v2372_v5 = vld [vmem:[%s2960_s2] sm:$0xff]  ;;  %v474_v6 = vsel %vm473_vm0, %v454_v3, 0.0  ;;  %775 = vmatpush.bf16.msra.mxu3 %v1928_v2  ;;  %v456_v12 = vld [vmem:[%s2354_s23 + $0x10] sm:$0xff]  ;;  %709 = vmatpush.bf16.msra.mxu1 %v1928_v2  ;;  %vm637_vm2 = vcmask 1041409   ;;  %vm640_vm3 = vcmask 1042434  }
  0x3a   : > { %v1927_v8 = vld [vmem:[%s2964_s6] sm:$0xff]  ;;  %v2381_v9 = vld [vmem:[%s2960_s2 + $0x8] sm:$0xff]  ;;  %v475_v10 = vsel %vm473_vm0, %v455_v4, 0.0  ;;  %v572_v11 = vadd.f32 %v2372_v5, %v454_v3  ;;  %v457_v16 = vld [vmem:[%s2354_s23 + $0x18] sm:$0xff]  ;;  %v483_v17 = vsel %vm473_vm0, %v456_v12, 0.0  ;;  %v574_v21 = vadd.f32 %v2372_v5, %v456_v12  ;;  %s1920_s20 = sshll.u32 %s2276_s25, 3 }
  0x3b   : > { %v476_v13 = vadd.f32 %v475_v10, %v474_v6  ;;  %v573_v15 = vadd.f32 %v2381_v9, %v455_v4  ;;  %v1926_v18 = vld [vmem:[%s2962_s4 + $0x8] sm:$0xff]  ;;  %v1925_v19 = vld [vmem:[%s2962_s4] sm:$0xff]  ;;  %v484_v20 = vsel %vm473_vm0, %v457_v16, 0.0  ;;  %v575_v22 = vadd.f32 %v2381_v9, %v457_v16  ;;  %v2405_v25 = vld [vmem:[%s2354_s23 + $0x30] sm:$0xff]  ;;  %s1824_s26 = sshll.u32 %s2350_s8, 3  ;;  %s1728_s16 = scalar_lea.hbm %s2970_s12, %s1920_s20 }
  0x3c   : > { %v2399_v23 = vld [vmem:[%s2354_s23 + $0x20] sm:$0xff]  ;;  %v2402_v24 = vld [vmem:[%s2354_s23 + $0x28] sm:$0xff]  ;;  %v485_v29 = vadd.f32 %v484_v20, %v483_v17  ;;  %679 = vmatpush.bf16.msra.mxu0 %v1926_v18  ;;  %v2410_v30 = vld [vmem:[%s2354_s23 + $0x38] sm:$0xff]  ;;  %v501_v38 = vsel %vm473_vm0, %v2405_v25, 0.0  ;;  %vm643_vm4 = vcmask 1043459   ;;  %vm646_vm5 = vcmask 1044484  }
  0x3d   : > { %v477_v26 = vrot.slane %v476_v13, 4  ;;  %v2407_v28 = vpack.c.bf16 %v573_v15, %v572_v11  ;;  %v2413_v31 = vld [vmem:[%s2354_s23 + $0x40] sm:$0xff]  ;;  %v2416_v32 = vld [vmem:[%s2354_s23 + $0x48] sm:$0xff]  ;;  %776 = vmatpush.bf16.msra.mxu3 %v1927_v8  ;;  %v2418_v33 = vpack.c.bf16 %v575_v22, %v574_v21  ;;  %710 = vmatpush.bf16.msra.mxu1 %v1927_v8  ;;  %v2421_v34 = vld [vmem:[%s2354_s23 + $0x50] sm:$0xff]  ;;  %v492_v36 = vsel %vm473_vm0, %v2399_v23, 0.0  ;;  %s451_s21 = scalar_lea.vmem [#allocation7], %s1824_s26 }
  0x3e   : > { %v2424_v35 = vld [vmem:[%s2354_s23 + $0x58] sm:$0xff]  ;;  %v493_v37 = vsel %vm473_vm0, %v2402_v24, 0.0  ;;  %v486_v41 = vrot.slane %v485_v29, 4  ;;  %v2433_v42 = vld [vmem:[%s2354_s23 + $0x60] sm:$0xff]  ;;  %v2436_v43 = vld [vmem:[%s2354_s23 + $0x68] sm:$0xff]  ;;  %v502_v46 = vsel %vm473_vm0, %v2410_v30, 0.0 }
  0x3f   : > { %v2001_v1 = vpop.eup %2000  ;;  %v478_v39 = vadd.f32 %v477_v26, %v476_v13  ;;  %v2439_v44 = vld [vmem:[%s2354_s23 + $0x70] sm:$0xff]  ;;  %v494_v45 = vadd.f32 %v493_v37, %v492_v36  ;;  %v510_v47 = vsel %vm473_vm0, %v2413_v31, 0.0  ;;  %v511_v48 = vsel %vm473_vm0, %v2416_v32, 0.0  ;;  %v2459_v60 = vld [vmem:[%s2354_s23 + $0x78] sm:$0xff]  ;;  %v1930_v63 = vld [vmem:[#allocation5 + $0x8] sm:$0xff]  ;;  %s1730_s17 = sshll.u32 %s451_s21, 4  ;;  %s1731_s17 = int_to_ptr.vmem [resolvable:$true] %s1730_s17 }
  0x40   : > { %v547_v7 = vmul.f32 16.0, %v2001_v1  ;;  %vm551_vm1 = vweird.f32 %v2001_v1  ;;  %v519_v49 = vsel %vm473_vm0, %v2421_v34, 0.0  ;;  %1852 = vmatmul.msk.bf16.vlgmr.msra.gmra.mxu3 %vm473_vm0, %v2407_v28  ;;  %v487_v52 = vadd.f32 %v486_v41, %v485_v29  ;;  %680 = vmatpush.bf16.msra.mxu0 %v1925_v19  ;;  %v1929_v10 = vld [vmem:[#allocation5] sm:$0xff]  ;;  %s1732_s23 = sshll.u32 %s1728_s16, 4  ;;  %s1718_s25 = scalar_lea.sflag [#allocation4], %s2350_s8  ;;  %s1733_s23 = int_to_ptr.hbm [resolvable:$true] %s1732_s23 }
  0x41   : > { %v479_v50 = vrot.slane %v478_v39, 2  ;;  %v495_v53 = vrot.slane %v494_v45, 4  ;;  %v503_v54 = vadd.f32 %v502_v46, %v501_v38  ;;  %v512_v55 = vadd.f32 %v511_v48, %v510_v47  ;;  %738 = vmatpush.bf16.msra.mxu2 %v1930_v63  ;;  %s2126_s14 = sshra.s32 %s1733_s23, 4  ;;  %s2132_s20 = scalar_lea.hbm %s2970_s12, 16  ;;  %s2127_s14 = int_to_ptr.hbm [resolvable:$true] %s2126_s14 }
  0x42   : > { %v548_v14 = vsub.f32 1.0, %v547_v7  ;;  %v520_v56 = vsel %vm473_vm0, %v2424_v35, 0.0  ;;  %v528_v57 = vsel %vm473_vm0, %v2433_v42, 0.0  ;;  %v488_v59 = vrot.slane %v487_v52, 2  ;;  %s2128_s29 = scalar_lea.hbm %s2127_s14, 8  ;;  %p2133_p11 = scmp.lt.s32.totalorder %s2127_s14, %s2970_s12 }
  0x43   : > { %v480_v58 = vadd.f32 %v479_v50, %v478_v39  ;;  %v496_v61 = vadd.f32 %v495_v53, %v494_v45  ;;  %v521_v62 = vadd.f32 %v520_v56, %v519_v49  ;;  %v504_v0 = vrot.slane %v503_v54, 4  ;;  %p2129_p1 = scmp.ne.s32.totalorder %s2127_s14, %s2128_s29  ;;  %p2134_p9 = scmp.lt.s32.totalorder %s2132_s20, %s2128_s29 }
  0x44   : > { %v549_v27 = vmul.f32 %v2001_v1, %v548_v14  ;;  %v529_v2 = vsel %vm473_vm0, %v2436_v43, 0.0  ;;  %v537_v3 = vsel %vm473_vm0, %v2439_v44, 0.0  ;;  %v489_v6 = vadd.f32 %v488_v59, %v487_v52  ;;  %824 = vmatpush.bf16.msrb.mxu0 %v1930_v63 }
  0x45   : > { %v481_v4 = vrot.slane %v480_v58, 1  ;;  %v497_v7 = vrot.slane %v496_v61, 2  ;;  %v522_v8 = vrot.slane %v521_v62, 4  ;;  %v505_v11 = vadd.f32 %v504_v0, %v503_v54  ;;  %739 = vmatpush.bf16.msra.mxu2 %v1929_v10  ;;  %p2130_p4 = pnand %p2129_p1, %p2322_p7  ;;  %p2135_p2 = por %p2134_p9, %p2133_p11 }
  0x46   : > { %v550_v40 = vadd.f32 %v2001_v1, %v549_v27  ;;  %v530_v13 = vadd.f32 %v529_v2, %v528_v57  ;;  %v538_v14 = vsel %vm473_vm0, %v2459_v60, 0.0  ;;  %v490_v16 = vrot.slane %v489_v6, 1  ;;  %v1995_v27 = vld [vmem:[%s2959_s1] ss:$0 sm:$0xff] }
  0x47   : > { %v482_v15 = vadd.f32 %v481_v4, %v480_v58  ;;  %v498_v17 = vadd.f32 %v497_v7, %v496_v61  ;;  %v523_v18 = vadd.f32 %v522_v8, %v521_v62  ;;  %v506_v19 = vrot.slane %v505_v11, 2  ;;  %p2131_p8 = pneg %p2130_p4 }
  0x48   : > { %v2450_v51 = vsel %vm551_vm1, %v2001_v1, %v550_v40  ;;  %v513_v1 = vrot.slane %v512_v55, 4  ;;  %v531_v21 = vrot.slane %v530_v13, 4  ;;  %v539_v22 = vadd.f32 %v538_v14, %v537_v3  ;;  %825 = vmatpush.bf16.msrb.mxu0 %v1929_v10 }
  0x49   : > { %v553_v26 = vmul.f32 %v2450_v51, %v482_v15  ;;  %v491_v29 = vadd.f32 %v490_v16, %v489_v6  ;;  %v499_v36 = vrot.slane %v498_v17, 1  ;;  %v524_v37 = vrot.slane %v523_v18, 2  ;;  %p2136_p10 = pnand %p2135_p2, %p2131_p8 }
  0x4a   : > { %v514_v12 = vadd.f32 %v513_v1, %v512_v55  ;;  %v507_v38 = vadd.f32 %v506_v19, %v505_v11  ;;  %v532_v40 = vadd.f32 %v531_v21, %v530_v13  ;;  %v540_v41 = vrot.slane %v539_v22, 4 }
  0x4b   : > { %v564_v45 = vadd.f32 %v1995_v27, %v553_v26  ;;  %v554_v46 = vmul.f32 %v2450_v51, %v491_v29  ;;  %v500_v47 = vadd.f32 %v499_v36, %v498_v17  ;;  %v525_v48 = vadd.f32 %v524_v37, %v523_v18 }
  0x4c   : > { %v515_v20 = vrot.slane %v514_v12, 2  ;;  %v508_v49 = vrot.slane %v507_v38, 1  ;;  %v533_v52 = vrot.slane %v532_v40, 2  ;;  %v541_v53 = vadd.f32 %v540_v41, %v539_v22 }
  0x4d   : > { %v588_v54 = vpack.c.bf16 %v564_v45, %v564_v45  ;;  %v565_v55 = vadd.f32 %v1995_v27, %v554_v46  ;;  %v526_v56 = vrot.slane %v525_v48, 1  ;;  %v555_v57 = vmul.f32 %v2450_v51, %v500_v47 }
  0x4e   : > { %v516_v39 = vadd.f32 %v515_v20, %v514_v12  ;;  %v509_v58 = vadd.f32 %v508_v49, %v507_v38  ;;  %v534_v61 = vadd.f32 %v533_v52, %v532_v40  ;;  %v542_v62 = vrot.slane %v541_v53, 2 }
  0x4f   : > { %v589_v63 = vpack.c.bf16 %v565_v55, %v565_v55  ;;  %v527_v0 = vadd.f32 %v526_v56, %v525_v48  ;;  %v566_v1 = vadd.f32 %v1995_v27, %v555_v57  ;;  %v628_v7 = vunpack.c.l.b16 %v588_v54 }
  0x50   : > { %v517_v50 = vrot.slane %v516_v39, 1  ;;  %v535_v2 = vrot.slane %v534_v61, 1  ;;  %v543_v3 = vadd.f32 %v542_v62, %v541_v53  ;;  %v556_v4 = vmul.f32 %v2450_v51, %v509_v58  ;;  %1853 = vmatmul.msk.bf16.gmra.mxu3 %vm473_vm0, %v2418_v33 }
  0x51   : > { %v629_v8 = vunpack.c.l.b16 %v589_v63  ;;  %v558_v10 = vmul.f32 %v2450_v51, %v527_v0  ;;  %v590_v11 = vpack.c.bf16 %v566_v1, %v566_v1  ;;  %vm649_vm6 = vcmask 1045509  }
  0x52   : > { %v518_v59 = vadd.f32 %v517_v50, %v516_v39  ;;  %v536_v12 = vadd.f32 %v535_v2, %v534_v61  ;;  %v544_v13 = vrot.slane %v543_v3, 1  ;;  %v567_v14 = vadd.f32 %v1995_v27, %v556_v4 }
  0x53   : > { %v636_v16 = vrot.slane %v629_v8, 7  ;;  %v569_v17 = vadd.f32 %v1995_v27, %v558_v10  ;;  %v630_v18 = vunpack.c.l.b16 %v590_v11  ;;  %v576_v52 = vadd.f32 %v2372_v5, %v2399_v23  ;;  %v1997_v8 = vld [vmem:[%s2963_s5] ss:$0 sm:$0xff] }
  0x54   : > { %v557_v6 = vmul.f32 %v2450_v51, %v518_v59  ;;  %v545_v19 = vadd.f32 %v544_v13, %v543_v3  ;;  %v559_v20 = vmul.f32 %v2450_v51, %v536_v12  ;;  %v591_v21 = vpack.c.bf16 %v567_v14, %v567_v14  ;;  %v2563_v13 = vld [vmem:[%s2965_s7] ss:$0 sm:$0xff] }
  0x55   : > { %v593_v26 = vpack.c.bf16 %v569_v17, %v569_v17  ;;  %v638_v29 = vsel %vm637_vm2, %v636_v16, %v628_v7  ;;  %v639_v36 = vrot.slane %v630_v18, 6  ;;  %vm652_vm7 = vcmask 1046534  }
  0x56   : > { %v568_v15 = vadd.f32 %v1995_v27, %v557_v6  ;;  %v560_v37 = vmul.f32 %v2450_v51, %v545_v19  ;;  %v570_v38 = vadd.f32 %v1995_v27, %v559_v20  ;;  %v631_v39 = vunpack.c.l.b16 %v591_v21 }
  0x57   : > { %v633_v41 = vunpack.c.l.b16 %v593_v26  ;;  %v641_v45 = vsel %vm640_vm3, %v639_v36, %v638_v29  ;;  %v577_v51 = vadd.f32 %v2381_v9, %v2402_v24  ;;  %vm655_vm8 = vcmask 1047559  }
  0x58   : > { %v592_v22 = vpack.c.bf16 %v568_v15, %v568_v15  ;;  %v571_v46 = vadd.f32 %v1995_v27, %v560_v37  ;;  %v594_v47 = vpack.c.bf16 %v570_v38, %v570_v38  ;;  %v642_v48 = vrot.slane %v631_v39, 5 }
  0x59   : > { %v648_v50 = vrot.slane %v633_v41, 3  ;;  %v598_v59 = vpack.c.bf16 %v577_v51, %v576_v52  ;;  %v578_v24 = vadd.f32 %v2372_v5, %v2405_v25  ;;  %v579_v0 = vadd.f32 %v2381_v9, %v2410_v30 }
  0x5a   : > { %v632_v40 = vunpack.c.l.b16 %v592_v22  ;;  %v595_v53 = vpack.c.bf16 %v571_v46, %v571_v46  ;;  %v634_v54 = vunpack.c.l.b16 %v594_v47  ;;  %v644_v55 = vsel %vm643_vm4, %v642_v48, %v641_v45 }
  0x5b   : > { %v599_v1 = vpack.c.bf16 %v579_v0, %v578_v24  ;;  %v582_v2 = vadd.f32 %v2372_v5, %v2421_v34  ;;  %v583_v3 = vadd.f32 %v2381_v9, %v2424_v35  ;;  %v580_v6 = vadd.f32 %v2372_v5, %v2413_v31 }
  0x5c   : > { %v645_v49 = vrot.slane %v632_v40, 4  ;;  %v635_v57 = vunpack.c.l.b16 %v595_v53  ;;  %v651_v58 = vrot.slane %v634_v54, 2  ;;  %v581_v25 = vadd.f32 %v2381_v9, %v2416_v32 }
  0x5d   : > { %v601_v4 = vpack.c.bf16 %v583_v3, %v582_v2  ;;  %v585_v34 = vadd.f32 %v2381_v9, %v2436_v43  ;;  %v586_v32 = vadd.f32 %v2372_v5, %v2439_v44  ;;  %v2552_v44 = vld [vmem:[%s2961_s3] sm:$0xff]  ;;  %vm1048_vm9 = vcmask 31744  }
  0x5e   : > { %v647_v56 = vsel %vm646_vm5, %v645_v49, %v644_v55  ;;  %v654_v62 = vrot.slane %v635_v57, 1  ;;  %v600_v30 = vpack.c.bf16 %v581_v25, %v580_v6  ;;  %vm1715_vm10 = vcmask 130048  }
  0x5f   : > { %v650_v27 = vsel %vm649_vm6, %v648_v50, %v647_v56 }
  0x60   : > { %v653_v61 = vsel %vm652_vm7, %v651_v58, %v650_v27  ;;  %1854 = vmatmul.msk.bf16.gmra.mxu3 %vm473_vm0, %v598_v59 }
  0x61   : > { %v656_v23 = vsel %vm655_vm8, %v654_v62, %v653_v61 }
  0x62   : > { %v657_v63 = vpack.c.b16 %v656_v23, %v656_v23 }
  0x64   : > { %1833 = vmatmul.msk.bf16.vlgmr.msra.gmra.mxu0 %vm473_vm0, %v657_v63  ;;  %1842 = vmatmul.msk.bf16.vlgmr.msra.gmra.mxu1 %vm473_vm0, %v657_v63 }
  0x65   : > { %1851 = vmatmul.msk.bf16.vlgmr.msra.gmra.mxu2 %vm473_vm0, %v657_v63 }
  0x70   : > { %1855 = vmatmul.msk.bf16.gmra.mxu3 %vm473_vm0, %v599_v1 }
  0x74   : > { %1860 = vmatmul.msk.bf16.vlgmr.msrb.gmra.mxu0 %vm473_vm0, %v2407_v28  ;;  %v584_v28 = vadd.f32 %v2372_v5, %v2433_v42  ;;  %v2530_v42 = vld [vmem:[%s2961_s3 + $0x18] sm:$0xff]  ;;  %v2537_v5 = vld [vmem:[%s2961_s3 + $0x10] sm:$0xff] }
  0x75   : > { %971 = vmatpush.msrb.mxu1 %v2530_v42  ;;  %1040 = vmatpush.msra.mxu0 %v2530_v42 }
  0x76   : > { %v602_v31 = vpack.c.bf16 %v585_v34, %v584_v28  ;;  %1885 = vmatpush.xpose.msk.msrb.mxu2 %vm1048_vm9, %v2530_v42  ;;  %1905 = vmatpush.xpose.msk.msrb.mxu3 %vm1048_vm9, %v2530_v42 }
  0x77   : > { %972 = vmatpush.msrb.mxu1 %v2537_v5  ;;  %1041 = vmatpush.msra.mxu0 %v2537_v5 }
  0x7a   : > { %1886 = vmatpush.xpose.msk.msrb.mxu2 %vm1048_vm9, %v2537_v5  ;;  %1906 = vmatpush.xpose.msk.msrb.mxu3 %vm1048_vm9, %v2537_v5 }
  0x80   : > { %1856 = vmatmul.msk.bf16.gmra.mxu3 %vm473_vm0, %v600_v30 }
  0x84   : > { %1861 = vmatmul.msk.bf16.gmra.mxu0 %vm473_vm0, %v2418_v33  ;;  %v587_v33 = vadd.f32 %v2381_v9, %v2459_v60  ;;  %v2545_v9 = vld [vmem:[%s2961_s3 + $0x8] sm:$0xff] }
  0x85   : > { %973 = vmatpush.msrb.mxu1 %v2545_v9  ;;  %1042 = vmatpush.msra.mxu0 %v2545_v9 }
  0x86   : > { %v603_v35 = vpack.c.bf16 %v587_v33, %v586_v32  ;;  %1887 = vmatpush.xpose.msk.msrb.mxu2 %vm1048_vm9, %v2545_v9  ;;  %1907 = vmatpush.xpose.msk.msrb.mxu3 %vm1048_vm9, %v2545_v9 }
  0x87   : > { %974 = vmatpush.msrb.mxu1 %v2552_v44  ;;  %1043 = vmatpush.msra.mxu0 %v2552_v44 }
  0x8a   : > { %1888 = vmatpush.xpose.msk.msrb.mxu2 %vm1048_vm9, %v2552_v44  ;;  %1908 = vmatpush.xpose.msk.msrb.mxu3 %vm1048_vm9, %v2552_v44 }
  0x90   : > { %1857 = vmatmul.msk.bf16.gmra.mxu3 %vm473_vm0, %v601_v4 }
  0x94   : > { %1862 = vmatmul.msk.bf16.gmra.mxu0 %vm473_vm0, %v598_v59 }
  0xa0   : > { %1858 = vmatmul.msk.bf16.gmra.mxu3 %vm473_vm0, %v602_v31 }
  0xa4   : > { %1863 = vmatmul.msk.bf16.gmra.mxu0 %vm473_vm0, %v599_v1 }
  0xb0   : > { %1859 = vmatmul.msk.bf16.gmra.mxu3 %vm473_vm0, %v603_v35 }
  0xb4   : > { %1864 = vmatmul.msk.bf16.gmra.mxu0 %vm473_vm0, %v600_v30 }
  0xc3   : > { %v778_v43 = vpop.f32.mrf.mxu3 }
  0xc4   : > { %1865 = vmatmul.msk.bf16.gmra.mxu0 %vm473_vm0, %v601_v4  ;;  %v779_v15 = vadd.f32 %v2563_v13, %v778_v43 }
  0xcb   : > { %v780_v60 = vpop.f32.mrf.mxu3 }
  0xcc   : > { %v781_v22 = vadd.f32 %v2563_v13, %v780_v60 }
  0xd3   : > { %v783_v7 = vpop.f32.mrf.mxu3 }
  0xd4   : > { %1866 = vmatmul.msk.bf16.gmra.mxu0 %vm473_vm0, %v602_v31  ;;  %v784_v39 = vadd.f32 %v2563_v13, %v783_v7 }
  0xdb   : > { %v785_v10 = vpop.f32.mrf.mxu3 }
  0xdc   : > { %v786_v47 = vadd.f32 %v2563_v13, %v785_v10 }
  0xe1   : > { %v682_v11 = vpop.f32.mrf.mxu0  ;;  %v712_v12 = vpop.f32.mrf.mxu1 }
  0xe2   : > { %v683_v14 = vadd.f32 %v1997_v8, %v682_v11  ;;  %v713_v26 = vadd.f32 %v2563_v13, %v712_v12 }
  0xe3   : > { %v788_v21 = vpop.f32.mrf.mxu3 }
  0xe4   : > { %v2566_v16 = vmul.f32 0.35355338, %v683_v14  ;;  %1867 = vmatmul.msk.bf16.gmra.mxu0 %vm473_vm0, %v603_v35  ;;  %v789_v51 = vadd.f32 %v2563_v13, %v788_v21 }
  0xe6   : > { %v879_v17 = vperm.slane %v2566_v16, 0  ;;  %v872_v29 = vrot.slane %v2566_v16, 1  ;;  %v1024_v38 = vmul.f32 %v713_v26, %v2566_v16  ;;  %v873_v52 = vrot.slane %v2566_v16, 2 }
  0xe7   : > { %v874_v59 = vrot.slane %v2566_v16, 3  ;;  %v875_v4 = vrot.slane %v2566_v16, 4  ;;  %v876_v43 = vrot.slane %v2566_v16, 5  ;;  %v878_v42 = vrot.slane %v2566_v16, 7 }
  0xe8   : > { %v895_v18 = vmul.f32 %v879_v17, %v779_v15  ;;  %v896_v36 = vmul.f32 %v879_v17, %v781_v22  ;;  %v880_v40 = vperm.slane %v872_v29, 0  ;;  %v881_v53 = vperm.slane %v873_v52, 0 }
  0xe9   : > { %v684_v19 = vpop.f32.mrf.mxu0  ;;  %v714_v20 = vpop.f32.mrf.mxu1  ;;  %v882_v23 = vperm.slane %v874_v59, 0  ;;  %v883_v25 = vperm.slane %v875_v4, 0  ;;  %v884_v7 = vperm.slane %v876_v43, 0  ;;  %v877_v15 = vrot.slane %v2566_v16, 6 }
  0xea   : > { %1868 = vmatmul.msk.f32.vlgmr.msrb.gmra.mxu1 %vm473_vm0, %v895_v18  ;;  %v897_v45 = vmul.f32 %v880_v40, %v784_v39  ;;  %v898_v49 = vmul.f32 %v880_v40, %v786_v47  ;;  %v899_v54 = vmul.f32 %v881_v53, %v789_v51  ;;  %v886_v5 = vperm.slane %v878_v42, 0 }
  0xeb   : > { %v790_v41 = vpop.f32.mrf.mxu3  ;;  %v885_v20 = vperm.slane %v877_v15, 0 }
  0xec   : > { %v791_v57 = vadd.f32 %v2563_v13, %v790_v41 }
  0xee   : > { %v900_v27 = vmul.f32 %v881_v53, %v791_v57 }
  0xf1   : > { %v2574_v37 = vpop.f32.mrf.mxu0 }
  0xf2   : > { %1869 = vmatmul.msk.f32.gmra.mxu1 %vm473_vm0, %v896_v36 }
  0xf3   : > { %v793_v48 = vpop.f32.mrf.mxu3 }
  0xf4   : > { %1884 = vmatmul.msk.f32.vlgmr.msra.gmra.mxu0 %vm473_vm0, %v1024_v38  ;;  %v794_v62 = vadd.f32 %v2563_v13, %v793_v48 }
  0xf6   : > { %v901_v63 = vmul.f32 %v882_v23, %v794_v62 }
  0xf9   : > { %v2580_v46 = vpop.f32.mrf.mxu0 }
  0xfa   : > { %1870 = vmatmul.msk.f32.gmra.mxu1 %vm473_vm0, %v897_v45 }
  0xfb   : > { %v795_v55 = vpop.f32.mrf.mxu3 }
  0xfc   : > { %v796_v0 = vadd.f32 %v2563_v13, %v795_v55 }
  0xfe   : > { %v902_v2 = vmul.f32 %v882_v23, %v796_v0 }
 0x101   : > { %v2584_v50 = vpop.f32.mrf.mxu0 }
 0x102   : > { %1871 = vmatmul.msk.f32.gmra.mxu1 %vm473_vm0, %v898_v49 }
 0x103   : > { %v798_v61 = vpop.f32.mrf.mxu3 }
 0x104   : > { %v799_v6 = vadd.f32 %v2563_v13, %v798_v61 }
 0x106   : > { %v903_v28 = vmul.f32 %v883_v25, %v799_v6 }
 0x109   : > { %v2589_v56 = vpop.f32.mrf.mxu0 }
 0x10a   : > { %1872 = vmatmul.msk.f32.gmra.mxu1 %vm473_vm0, %v899_v54 }
 0x10b   : > { %v800_v1 = vpop.f32.mrf.mxu3 }
 0x10c   : > { %v801_v31 = vadd.f32 %v2563_v13, %v800_v1 }
 0x10e   : > { %v904_v32 = vmul.f32 %v883_v25, %v801_v31 }
 0x111   : > { %v2593_v58 = vpop.f32.mrf.mxu0 }
 0x112   : > { %1873 = vmatmul.msk.f32.gmra.mxu1 %vm473_vm0, %v900_v27 }
 0x113   : > { %v803_v30 = vpop.f32.mrf.mxu3 }
 0x114   : > { %v804_v60 = vadd.f32 %v2563_v13, %v803_v30 }
 0x116   : > { %v905_v8 = vmul.f32 %v884_v7, %v804_v60 }
 0x119   : > { %v2598_v24 = vpop.f32.mrf.mxu0 }
 0x11a   : > { %1874 = vmatmul.msk.f32.gmra.mxu1 %vm473_vm0, %v901_v63 }
 0x11b   : > { %v805_v33 = vpop.f32.mrf.mxu3 }
 0x11c   : > { %v806_v12 = vadd.f32 %v2563_v13, %v805_v33 }
 0x11e   : > { %v906_v14 = vmul.f32 %v884_v7, %v806_v12 }
 0x121   : > { %v2602_v3 = vpop.f32.mrf.mxu0 }
 0x122   : > { %1875 = vmatmul.msk.f32.gmra.mxu1 %vm473_vm0, %v902_v2 }
 0x123   : > { %v808_v11 = vpop.f32.mrf.mxu3 }
 0x124   : > { %v809_v18 = vadd.f32 %v2563_v13, %v808_v11 }
 0x126   : > { %v907_v21 = vmul.f32 %v885_v20, %v809_v18 }
 0x129   : > { %v2607_v34 = vpop.f32.mrf.mxu0 }
 0x12a   : > { %1876 = vmatmul.msk.f32.gmra.mxu1 %vm473_vm0, %v903_v28 }
 0x12b   : > { %v810_v19 = vpop.f32.mrf.mxu3 }
 0x12c   : > { %v811_v22 = vadd.f32 %v2563_v13, %v810_v19 }
 0x12e   : > { %v908_v36 = vmul.f32 %v885_v20, %v811_v22 }
 0x131   : > { %v2611_v35 = vpop.f32.mrf.mxu0 }
 0x132   : > { %1877 = vmatmul.msk.f32.gmra.mxu1 %vm473_vm0, %v904_v32 }
 0x133   : > { %v813_v29 = vpop.f32.mrf.mxu3 }
 0x134   : > { %v814_v38 = vadd.f32 %v2563_v13, %v813_v29 }
 0x136   : > { %v909_v40 = vmul.f32 %v886_v5, %v814_v38 }
 0x139   : > { %v2616_v10 = vpop.f32.mrf.mxu0 }
 0x13a   : > { %1878 = vmatmul.msk.f32.gmra.mxu1 %vm473_vm0, %v905_v8 }
 0x13b   : > { %v815_v41 = vpop.f32.mrf.mxu3 }
 0x13c   : > { %v816_v9 = vadd.f32 %v2563_v13, %v815_v41 }
 0x13e   : > { %v910_v16 = vmul.f32 %v886_v5, %v816_v9 }
 0x141   : > { %v2621_v17 = vpop.f32.mrf.mxu0 }
 0x142   : > { %1879 = vmatmul.msk.f32.gmra.mxu1 %vm473_vm0, %v906_v14 }
 0x149   : > { %v2631_v26 = vpop.f32.mrf.mxu0 }
 0x14a   : > { %1880 = vmatmul.msk.f32.gmra.mxu1 %vm473_vm0, %v907_v21 }
 0x151   : > { %v2648_v39 = vpop.f32.mrf.mxu0 }
 0x152   : > { %1881 = vmatmul.msk.f32.gmra.mxu1 %vm473_vm0, %v908_v36 }
 0x159   : > { %v2652_v45 = vpop.f32.mrf.mxu0 }
 0x15a   : > { %1882 = vmatmul.msk.f32.gmra.mxu1 %vm473_vm0, %v909_v40 }
 0x161   : > { %v2655_v48 = vpop.f32.mrf.mxu0 }
 0x162   : > { %1883 = vmatmul.msk.f32.gmra.mxu1 %vm473_vm0, %v910_v16 }
 0x167   : > { %v976_v47 = vpop.f32.mrf.mxu1 }
 0x168   : > { %v1049_v44 = vsel %vm1048_vm9, %v976_v47, -inf }
 0x169   : > { %v2659_v54 = vpop.f32.mrf.mxu0 }
 0x16a   : > { %2988 = vst [vmem:[#allocation16_spill] sm:$0xff] %v2659_v54 }
 0x16f   : > { %v979_v49 = vpop.f32.mrf.mxu1 }
 0x170   : > { %v1050_v52 = vsel %vm1048_vm9, %v979_v49, -inf }
 0x171   : > { %v1051_v51 = vmax.f32 %v1049_v44, %v1050_v52  ;;  %v2661_v62 = vpop.f32.mrf.mxu0 }
 0x172   : > { %v1122_v12 = vrot.slane %v2661_v62, 1 }
 0x173   : > { %v1052_v53 = vrot.slane %v1051_v51, 4 }
 0x175   : > { %v1053_v55 = vmax.f32 %v1051_v51, %v1052_v53 }
 0x177   : > { %v1054_v57 = vrot.slane %v1053_v55, 2  ;;  %v982_v13 = vpop.f32.mrf.mxu1 }
 0x178   : > { %v1058_v0 = vsel %vm1048_vm9, %v982_v13, -inf }
 0x179   : > { %v1055_v27 = vmax.f32 %v1053_v55, %v1054_v57 }
 0x17b   : > { %v1056_v59 = vrot.slane %v1055_v27, 1 }
 0x17d   : > { %v1057_v61 = vmax.f32 %v1055_v27, %v1056_v59  ;;  %v1123_v27 = vrot.slane %v2661_v62, 2 }
 0x17f   : > { %v985_v23 = vpop.f32.mrf.mxu1  ;;  %v1137_v63 = vmax.f32 %v1057_v61, %v2661_v62 }
 0x180   : > { %v1059_v1 = vsel %vm1048_vm9, %v985_v23, -inf }
 0x181   : > { %v1060_v2 = vmax.f32 %v1058_v0, %v1059_v1  ;;  %v1145_v4 = vperm.slane %v1137_v63, 0 }
 0x183   : > { %v1061_v6 = vrot.slane %v1060_v2, 4  ;;  %v1153_v25 = vsub.f32 %v976_v47, %v1145_v4  ;;  %v1154_v30 = vsub.f32 %v979_v49, %v1145_v4 }
 0x185   : > { %v1062_v28 = vmax.f32 %v1060_v2, %v1061_v6  ;;  %v1169_v31 = vmul.f32 1.442695, %v1153_v25  ;;  %v1171_v32 = vmul.f32 1.442695, %v1154_v30 }
 0x187   : > { %v1063_v33 = vrot.slane %v1062_v28, 2  ;;  %v988_v43 = vpop.f32.mrf.mxu1  ;;  %2002 = vpow2.f32 %v1169_v31 }
 0x188   : > { %2004 = vpow2.f32 %v1171_v32  ;;  %v1067_v21 = vsel %vm1048_vm9, %v988_v43, -inf }
 0x189   : > { %v1064_v60 = vmax.f32 %v1062_v28, %v1063_v33 }
 0x18b   : > { %v1065_v7 = vrot.slane %v1064_v60, 1 }
 0x18d   : > { %v2666_v8 = vpop.eup %2002  ;;  %v1066_v11 = vmax.f32 %v1064_v60, %v1065_v7 }
 0x18e   : > { %v2669_v14 = vpop.eup %2004  ;;  %v1227_v15 = vsel %vm1048_vm9, %v2666_v8, 0.0 }
 0x18f   : > { %v1138_v18 = vmax.f32 %v1066_v11, %v1122_v12  ;;  %v991_v19 = vpop.f32.mrf.mxu1  ;;  %v1228_v20 = vsel %vm1048_vm9, %v2669_v14, 0.0 }
 0x190   : > { %v1068_v22 = vsel %vm1048_vm9, %v991_v19, -inf  ;;  %v2677_v29 = vadd.f32 %v1228_v20, %v1227_v15 }
 0x191   : > { %v1146_v36 = vperm.slane %v1138_v18, 0  ;;  %v1209_v42 = vrot.slane %v1138_v18, 7  ;;  %v1069_v38 = vmax.f32 %v1067_v21, %v1068_v22  ;;  %v1124_v22 = vrot.slane %v2661_v62, 3 }
 0x193   : > { %v1155_v5 = vsub.f32 %v982_v13, %v1146_v36  ;;  %v1156_v40 = vsub.f32 %v985_v23, %v1146_v36  ;;  %v1210_v41 = vsel %vm637_vm2, %v1209_v42, %v1137_v63  ;;  %v1070_v9 = vrot.slane %v1069_v38, 4 }
 0x195   : > { %v1173_v16 = vmul.f32 1.442695, %v1155_v5  ;;  %v1175_v47 = vmul.f32 1.442695, %v1156_v40  ;;  %v1071_v49 = vmax.f32 %v1069_v38, %v1070_v9 }
 0x197   : > { %2006 = vpow2.f32 %v1173_v16  ;;  %v1072_v44 = vrot.slane %v1071_v49, 2  ;;  %v2680_v52 = vpop.f32.mrf.mxu1 }
 0x198   : > { %2008 = vpow2.f32 %v1175_v47  ;;  %v1076_v1 = vsel %vm1048_vm9, %v2680_v52, -inf }
 0x199   : > { %v1073_v51 = vmax.f32 %v1071_v49, %v1072_v44 }
 0x19b   : > { %v1074_v53 = vrot.slane %v1073_v51, 1 }
 0x19d   : > { %v2682_v55 = vpop.eup %2006  ;;  %v1075_v57 = vmax.f32 %v1073_v51, %v1074_v53 }
 0x19e   : > { %v2685_v13 = vpop.eup %2008  ;;  %v1236_v59 = vsel %vm1048_vm9, %v2682_v55, 0.0 }
 0x19f   : > { %v1237_v61 = vsel %vm1048_vm9, %v2685_v13, 0.0  ;;  %v1139_v23 = vmax.f32 %v1075_v57, %v1123_v27  ;;  %v997_v63 = vpop.f32.mrf.mxu1 }
 0x1a0   : > { %v2691_v0 = vadd.f32 %v1237_v61, %v1236_v59  ;;  %v1077_v2 = vsel %vm1048_vm9, %v997_v63, -inf }
 0x1a1   : > { %v1147_v4 = vperm.slane %v1139_v23, 0  ;;  %v1211_v6 = vrot.slane %v1139_v23, 6  ;;  %v1078_v25 = vmax.f32 %v1076_v1, %v1077_v2 }
 0x1a3   : > { %v1157_v30 = vsub.f32 %v988_v43, %v1147_v4  ;;  %v1158_v28 = vsub.f32 %v991_v19, %v1147_v4  ;;  %v1212_v31 = vsel %vm640_vm3, %v1211_v6, %v1210_v41  ;;  %v1079_v32 = vrot.slane %v1078_v25, 4 }
 0x1a5   : > { %v1177_v33 = vmul.f32 1.442695, %v1157_v30  ;;  %v1179_v60 = vmul.f32 1.442695, %v1158_v28  ;;  %v1080_v7 = vmax.f32 %v1078_v25, %v1079_v32 }
 0x1a7   : > { %2010 = vpow2.f32 %v1177_v33  ;;  %v1081_v11 = vrot.slane %v1080_v7, 2  ;;  %v1000_v12 = vpop.f32.mrf.mxu1 }
 0x1a8   : > { %2012 = vpow2.f32 %v1179_v60  ;;  %v1085_v40 = vsel %vm1048_vm9, %v1000_v12, -inf }
 0x1a9   : > { %v1082_v15 = vmax.f32 %v1080_v7, %v1081_v11 }
 0x1ab   : > { %v1083_v18 = vrot.slane %v1082_v15, 1 }
 0x1ad   : > { %v2697_v20 = vpop.eup %2010  ;;  %v1084_v21 = vmax.f32 %v1082_v15, %v1083_v18  ;;  %v1126_v15 = vrot.slane %v2661_v62, 5 }
 0x1ae   : > { %v2700_v36 = vpop.eup %2012  ;;  %v1245_v43 = vsel %vm1048_vm9, %v2697_v20, 0.0 }
 0x1af   : > { %v1246_v19 = vsel %vm1048_vm9, %v2700_v36, 0.0  ;;  %v1140_v42 = vmax.f32 %v1084_v21, %v1124_v22  ;;  %v1003_v38 = vpop.f32.mrf.mxu1 }
 0x1b0   : > { %v2706_v5 = vadd.f32 %v1246_v19, %v1245_v43  ;;  %v1086_v41 = vsel %vm1048_vm9, %v1003_v38, -inf }
 0x1b1   : > { %v1148_v9 = vperm.slane %v1140_v42, 0  ;;  %v1213_v16 = vrot.slane %v1140_v42, 5  ;;  %v1087_v47 = vmax.f32 %v1085_v40, %v1086_v41 }
 0x1b3   : > { %v1160_v49 = vsub.f32 %v997_v63, %v1148_v9  ;;  %v2711_v44 = vsel %vm643_vm4, %v1213_v16, %v1212_v31  ;;  %v1088_v51 = vrot.slane %v1087_v47, 4  ;;  %v1125_v63 = vrot.slane %v2661_v62, 4 }
 0x1b4   : > { %v1159_v18 = vsub.f32 %v2680_v52, %v1148_v9 }
 0x1b5   : > { %v1089_v53 = vmax.f32 %v1087_v47, %v1088_v51 }
 0x1b6   : > { %v1181_v47 = vmul.f32 1.442695, %v1159_v18 }
 0x1b7   : > { %v1006_v57 = vpop.f32.mrf.mxu1  ;;  %v1090_v27 = vrot.slane %v1089_v53, 2 }
 0x1b8   : > { %v1094_v23 = vsel %vm1048_vm9, %v1006_v57, -inf  ;;  %2014 = vpow2.f32 %v1181_v47 }
 0x1b9   : > { %v1091_v59 = vmax.f32 %v1089_v53, %v1090_v27  ;;  %v1183_v27 = vmul.f32 1.442695, %v1160_v49 }
 0x1bb   : > { %v1092_v2 = vrot.slane %v1091_v59, 1  ;;  %2016 = vpow2.f32 %v1183_v27 }
 0x1bd   : > { %v1093_v25 = vmax.f32 %v1091_v59, %v1092_v2 }
 0x1bf   : > { %v1009_v61 = vpop.f32.mrf.mxu1  ;;  %v2716_v32 = vmax.f32 %v1093_v25, %v1125_v63 }
 0x1c0   : > { %v1095_v1 = vsel %vm1048_vm9, %v1009_v61, -inf }
 0x1c1   : > { %v1096_v4 = vmax.f32 %v1094_v23, %v1095_v1  ;;  %v1149_v7 = vperm.slane %v2716_v32, 0 }
 0x1c3   : > { %v1097_v6 = vrot.slane %v1096_v4, 4  ;;  %v1161_v42 = vsub.f32 %v1000_v12, %v1149_v7  ;;  %v1162_v16 = vsub.f32 %v1003_v38, %v1149_v7 }
 0x1c5   : > { %v1098_v30 = vmax.f32 %v1096_v4, %v1097_v6  ;;  %v1185_v23 = vmul.f32 1.442695, %v1161_v42  ;;  %v1187_v52 = vmul.f32 1.442695, %v1162_v16 }
 0x1c7   : > { %v1099_v28 = vrot.slane %v1098_v30, 2  ;;  %v1012_v31 = vpop.f32.mrf.mxu1  ;;  %2018 = vpow2.f32 %v1185_v23 }
 0x1c8   : > { %v1103_v43 = vsel %vm1048_vm9, %v1012_v31, -inf  ;;  %2020 = vpow2.f32 %v1187_v52 }
 0x1c9   : > { %v1100_v33 = vmax.f32 %v1098_v30, %v1099_v28 }
 0x1cb   : > { %v1101_v60 = vrot.slane %v1100_v33, 1 }
 0x1cd   : > { %v1102_v11 = vmax.f32 %v1100_v33, %v1101_v60 }
 0x1cf   : > { %v2721_v21 = vmax.f32 %v1102_v11, %v1126_v15  ;;  %v1015_v22 = vpop.f32.mrf.mxu1 }
 0x1d0   : > { %v1104_v19 = vsel %vm1048_vm9, %v1015_v22, -inf }
 0x1d1   : > { %v1150_v40 = vperm.slane %v2721_v21, 0  ;;  %v1105_v41 = vmax.f32 %v1103_v43, %v1104_v19 }
 0x1d3   : > { %v1163_v51 = vsub.f32 %v1006_v57, %v1150_v40  ;;  %v1106_v53 = vrot.slane %v1105_v41, 4  ;;  %v1164_v59 = vsub.f32 %v1009_v61, %v1150_v40  ;;  %v2728_v57 = vpop.eup %2014  ;;  %v1127_v61 = vrot.slane %v2661_v62, 6 }
 0x1d4   : > { %v2731_v25 = vpop.eup %2016  ;;  %v1254_v19 = vsel %vm1048_vm9, %v2728_v57, 0.0 }
 0x1d5   : > { %v1107_v1 = vmax.f32 %v1105_v41, %v1106_v53  ;;  %v1189_v9 = vmul.f32 1.442695, %v1163_v51  ;;  %v1191_v6 = vmul.f32 1.442695, %v1164_v59  ;;  %v2733_v30 = vpop.eup %2018  ;;  %v1255_v42 = vsel %vm1048_vm9, %v2731_v25, 0.0 }
 0x1d6   : > { %v2737_v33 = vpop.eup %2020  ;;  %v1263_v47 = vsel %vm1048_vm9, %v2733_v30, 0.0  ;;  %v1256_v52 = vadd.f32 %v1255_v42, %v1254_v19 }
 0x1d7   : > { %v1108_v2 = vrot.slane %v1107_v1, 2  ;;  %v2726_v4 = vpop.f32.mrf.mxu1  ;;  %2022 = vpow2.f32 %v1189_v9  ;;  %v1264_v51 = vsel %vm1048_vm9, %v2737_v33, 0.0 }
 0x1d8   : > { %2024 = vpow2.f32 %v1191_v6  ;;  %v1112_v60 = vsel %vm1048_vm9, %v2726_v4, -inf  ;;  %v1265_v9 = vadd.f32 %v1264_v51, %v1263_v47  ;;  %v1239_v6 = vrot.slane %v2691_v0, 4 }
 0x1d9   : > { %v1109_v12 = vmax.f32 %v1107_v1, %v1108_v2  ;;  %v1230_v2 = vrot.slane %v2677_v29, 4 }
 0x1da   : > { %v1240_v42 = vadd.f32 %v1239_v6, %v2691_v0 }
 0x1db   : > { %v1110_v38 = vrot.slane %v1109_v12, 1 }
 0x1dd   : > { %v1111_v49 = vmax.f32 %v1109_v12, %v1110_v38  ;;  %v2743_v11 = vpop.eup %2022  ;;  %v1248_v38 = vrot.slane %v2706_v5, 4 }
 0x1de   : > { %v2745_v43 = vpop.eup %2024  ;;  %v1272_v53 = vsel %vm1048_vm9, %v2743_v11, 0.0 }
 0x1df   : > { %v1143_v63 = vmax.f32 %v1111_v49, %v1127_v61  ;;  %v2735_v28 = vpop.f32.mrf.mxu1  ;;  %v1273_v27 = vsel %vm1048_vm9, %v2745_v43, 0.0  ;;  %v1257_v49 = vrot.slane %v1256_v52, 4  ;;  %v1266_v61 = vrot.slane %v1265_v9, 4 }
 0x1e0   : > { %v1113_v7 = vsel %vm1048_vm9, %v2735_v28, -inf  ;;  %v1249_v51 = vadd.f32 %v1248_v38, %v2706_v5 }
 0x1e1   : > { %v1151_v15 = vperm.slane %v1143_v63, 0  ;;  %v1114_v18 = vmax.f32 %v1112_v60, %v1113_v7  ;;  %v1215_v7 = vrot.slane %v2716_v32, 4 }
 0x1e3   : > { %v1165_v40 = vsub.f32 %v1012_v31, %v1151_v15  ;;  %v1166_v41 = vsub.f32 %v1015_v22, %v1151_v15  ;;  %v1115_v16 = vrot.slane %v1114_v18, 4  ;;  %v1274_v22 = vadd.f32 %v1273_v27, %v1272_v53 }
 0x1e4   : > { %v1258_v53 = vadd.f32 %v1257_v49, %v1256_v52  ;;  %v1219_v27 = vrot.slane %v1143_v63, 2  ;;  %v1216_v0 = vsel %vm646_vm5, %v1215_v7, %v2711_v44  ;;  %v1250_v63 = vrot.slane %v1249_v51, 2 }
 0x1e5   : > { %v1193_v59 = vmul.f32 1.442695, %v1165_v40  ;;  %v1195_v23 = vmul.f32 1.442695, %v1166_v41  ;;  %v1116_v1 = vmax.f32 %v1114_v18, %v1115_v16  ;;  %v1275_v15 = vrot.slane %v1274_v22, 4 }
 0x1e6   : > { %v1231_v18 = vadd.f32 %v1230_v2, %v2677_v29  ;;  %v1217_v40 = vrot.slane %v2721_v21, 3  ;;  %v1128_v16 = vrot.slane %v2661_v62, 7  ;;  %v1241_v2 = vrot.slane %v1240_v42, 2 }
 0x1e7   : > { %2026 = vpow2.f32 %v1193_v59  ;;  %v1117_v31 = vrot.slane %v1116_v1, 2  ;;  %v1267_v59 = vadd.f32 %v1266_v61, %v1265_v9  ;;  %v1276_v21 = vadd.f32 %v1275_v15, %v1274_v22 }
 0x1e8   : > { %2028 = vpow2.f32 %v1195_v23  ;;  %v1218_v6 = vsel %vm649_vm6, %v1217_v40, %v1216_v0 }
 0x1e9   : > { %v1118_v12 = vmax.f32 %v1116_v1, %v1117_v31  ;;  %v1232_v31 = vrot.slane %v1231_v18, 2  ;;  %v1220_v38 = vsel %vm652_vm7, %v1219_v27, %v1218_v6  ;;  %v1268_v49 = vrot.slane %v1267_v59, 2 }
 0x1ea   : > { %v1277_v22 = vrot.slane %v1276_v21, 2 }
 0x1eb   : > { %v1119_v60 = vrot.slane %v1118_v12, 1  ;;  %v1269_v27 = vadd.f32 %v1268_v49, %v1267_v59 }
 0x1ec   : > { %v1278_v54 = vadd.f32 %v1277_v22, %v1276_v21 }
 0x1ed   : > { %v2764_v19 = vpop.eup %2026  ;;  %v1120_v41 = vmax.f32 %v1118_v12, %v1119_v60  ;;  %v1259_v12 = vrot.slane %v1258_v53, 2 }
 0x1ee   : > { %v2769_v47 = vpop.eup %2028  ;;  %v1281_v32 = vsel %vm1048_vm9, %v2764_v19, 0.0 }
 0x1ef   : > { %v1282_v29 = vsel %vm1048_vm9, %v2769_v47, 0.0  ;;  %v1144_v23 = vmax.f32 %v1120_v41, %v1128_v16  ;;  %v1242_v16 = vadd.f32 %v1241_v2, %v1240_v42  ;;  %v1260_v0 = vadd.f32 %v1259_v12, %v1258_v53 }
 0x1f0   : > { %v1283_v1 = vadd.f32 %v1282_v29, %v1281_v32  ;;  %v1251_v32 = vadd.f32 %v1250_v63, %v1249_v51 }
 0x1f1   : > { %v1152_v5 = vperm.slane %v1144_v23, 0  ;;  %v1221_v52 = vrot.slane %v1144_v23, 1  ;;  %v1233_v23 = vadd.f32 %v1232_v31, %v1231_v18 }
 0x1f2   : > { %v1284_v9 = vrot.slane %v1283_v1, 4 }
 0x1f3   : > { %v1167_v61 = vsub.f32 %v2726_v4, %v1152_v5  ;;  %v1168_v60 = vsub.f32 %v2735_v28, %v1152_v5  ;;  %v1222_v44 = vsel %vm655_vm8, %v1221_v52, %v1220_v38  ;;  %v1243_v4 = vrot.slane %v1242_v16, 1 }
 0x1f4   : > { %v1285_v7 = vadd.f32 %v1284_v9, %v1283_v1  ;;  %v1224_v15 = vsub.f32 %v2661_v62, %v1222_v44  ;;  %v1252_v28 = vrot.slane %v1251_v32, 1  ;;  %v1234_v5 = vrot.slane %v1233_v23, 1 }
 0x1f5   : > { %v1197_v41 = vmul.f32 1.442695, %v1167_v61  ;;  %v1199_v40 = vmul.f32 1.442695, %v1168_v60  ;;  %v1261_v52 = vrot.slane %v1260_v0, 1  ;;  %v1270_v1 = vrot.slane %v1269_v27, 1 }
 0x1f6   : > { %v1225_v29 = vmul.f32 1.442695, %v1224_v15  ;;  %v1286_v6 = vrot.slane %v1285_v7, 2  ;;  %v1279_v62 = vrot.slane %v1278_v54, 1  ;;  %v1244_v51 = vadd.f32 %v1243_v4, %v1242_v16 }
 0x1f7   : > { %2030 = vpow2.f32 %v1197_v41  ;;  %v1253_v18 = vadd.f32 %v1252_v28, %v1251_v32  ;;  %v1235_v59 = vadd.f32 %v1234_v5, %v1233_v23  ;;  %v1262_v31 = vadd.f32 %v1261_v52, %v1260_v0 }
 0x1f8   : > { %2032 = vpow2.f32 %v1199_v40  ;;  %v1287_v38 = vadd.f32 %v1286_v6, %v1285_v7  ;;  %v1271_v2 = vadd.f32 %v1270_v1, %v1269_v27  ;;  %v1280_v49 = vadd.f32 %v1279_v62, %v1278_v54 }
 0x1f9   : > { %2034 = vpow2.f32 %v1225_v29 }
 0x1fa   : > { %v1288_v63 = vrot.slane %v1287_v38, 1 }
 0x1fc   : > { %v1289_v29 = vadd.f32 %v1288_v63, %v1287_v38 }
 0x1fd   : > { %v2784_v9 = vpop.eup %2030 }
 0x1fe   : > { %v2786_v42 = vpop.eup %2032  ;;  %v1290_v53 = vsel %vm1048_vm9, %v2784_v9, 0.0 }
 0x1ff   : > { %v2790_v21 = vpop.eup %2034  ;;  %v1291_v12 = vsel %vm1048_vm9, %v2786_v42, 0.0 }
 0x200   : > { %v1292_v61 = vadd.f32 %v1291_v12, %v1290_v53  ;;  %v1315_v60 = vadd.f32 %v2790_v21, %v1235_v59  ;;  %v1300_v44 = vrot.slane %v2790_v21, 1  ;;  %v1301_v22 = vrot.slane %v2790_v21, 2 }
 0x201   : > { %v1302_v7 = vrot.slane %v2790_v21, 3  ;;  %v1303_v15 = vrot.slane %v2790_v21, 4  ;;  %v1304_v41 = vrot.slane %v2790_v21, 5  ;;  %v1305_v16 = vrot.slane %v2790_v21, 6 }
 0x202   : > { %v1293_v40 = vrot.slane %v1292_v61, 4  ;;  %2036 = vrcp.f32 %v1315_v60  ;;  %v1316_v32 = vadd.f32 %v1300_v44, %v1244_v51  ;;  %v1317_v54 = vadd.f32 %v1301_v22, %v1253_v18 }
 0x203   : > { %v1318_v23 = vadd.f32 %v1302_v7, %v1262_v31  ;;  %v1319_v0 = vadd.f32 %v1303_v15, %v1271_v2  ;;  %v1320_v6 = vadd.f32 %v1304_v41, %v1280_v49  ;;  %v1321_v4 = vadd.f32 %v1305_v16, %v1289_v29 }
 0x204   : > { %v1294_v27 = vadd.f32 %v1293_v40, %v1292_v61  ;;  %2038 = vrcp.f32 %v1316_v32  ;;  %v1306_v12 = vrot.slane %v2790_v21, 7 }
 0x205   : > { %2040 = vrcp.f32 %v1317_v54 }
 0x206   : > { %v1295_v28 = vrot.slane %v1294_v27, 2  ;;  %2042 = vrcp.f32 %v1318_v23 }
 0x207   : > { %2044 = vrcp.f32 %v1319_v0 }
 0x208   : > { %v2037_v5 = vpop.eup %2036  ;;  %v1296_v52 = vadd.f32 %v1295_v28, %v1294_v27  ;;  %2046 = vrcp.f32 %v1320_v6 }
 0x209   : > { %v1331_v1 = vperm.slane %v2037_v5, 0  ;;  %2048 = vrcp.f32 %v1321_v4 }
 0x20a   : > { %v2039_v62 = vpop.eup %2038  ;;  %v1297_v53 = vrot.slane %v1296_v52, 1 }
 0x20b   : > { %v2041_v51 = vpop.eup %2040  ;;  %v1339_v38 = vmul.f32 %v2666_v8, %v1331_v1  ;;  %v1340_v18 = vmul.f32 %v2669_v14, %v1331_v1  ;;  %v1363_v59 = vrot.slane %v2039_v62, 7  ;;  %v1332_v31 = vperm.slane %v2039_v62, 0 }
 0x20c   : > { %v2043_v2 = vpop.eup %2042  ;;  %v1298_v63 = vadd.f32 %v1297_v53, %v1296_v52  ;;  %v1365_v49 = vrot.slane %v2041_v51, 6  ;;  %v1333_v61 = vperm.slane %v2041_v51, 0 }
 0x20d   : > { %v2045_v60 = vpop.eup %2044  ;;  %1889 = vmatmul.msk.f32.vlgmr.msrb.gmra.mxu2 %vm1048_vm9, %v1339_v38  ;;  %v1364_v44 = vsel %vm637_vm2, %v1363_v59, %v2037_v5  ;;  %v1367_v22 = vrot.slane %v2043_v2, 5  ;;  %v1341_v7 = vmul.f32 %v2682_v55, %v1332_v31  ;;  %v1342_v8 = vmul.f32 %v2685_v13, %v1332_v31 }
 0x20e   : > { %v2047_v15 = vpop.eup %2046  ;;  %v1322_v14 = vadd.f32 %v1306_v12, %v1298_v63  ;;  %v1366_v41 = vsel %vm640_vm3, %v1365_v49, %v1364_v44  ;;  %v1369_v40 = vrot.slane %v2045_v60, 4  ;;  %v1343_v16 = vmul.f32 %v2697_v20, %v1333_v61 }
 0x20f   : > { %v2049_v32 = vpop.eup %2048  ;;  %v1368_v29 = vsel %vm643_vm4, %v1367_v22, %v1366_v41  ;;  %v1371_v54 = vrot.slane %v2047_v15, 3  ;;  %v1344_v23 = vmul.f32 %v2700_v36, %v1333_v61  ;;  %v1334_v0 = vperm.slane %v2043_v2, 0 }
 0x210   : > { %2050 = vrcp.f32 %v1322_v14  ;;  %v1370_v27 = vsel %vm646_vm5, %v1369_v40, %v1368_v29  ;;  %v1373_v55 = vrot.slane %v2049_v32, 2  ;;  %v1336_v4 = vperm.slane %v2047_v15, 0 }
 0x211   : > { %v1372_v13 = vsel %vm649_vm6, %v1371_v54, %v1370_v27  ;;  %v1345_v6 = vmul.f32 %v2728_v57, %v1334_v0  ;;  %v1337_v5 = vperm.slane %v2049_v32, 0 }
 0x212   : > { %v1374_v28 = vsel %vm652_vm7, %v1373_v55, %v1372_v13  ;;  %v1349_v20 = vmul.f32 %v2743_v11, %v1336_v4  ;;  %v1350_v52 = vmul.f32 %v2745_v43, %v1336_v4  ;;  %v1346_v11 = vmul.f32 %v2731_v25, %v1334_v0  ;;  %v2846_v25 = vld [vmem:[%s2967_s9] ss:$0 sm:$0xff] }
 0x213   : > { %v1351_v1 = vmul.f32 %v2764_v19, %v1337_v5  ;;  %v1352_v36 = vmul.f32 %v2769_v47, %v1337_v5  ;;  %v1335_v43 = vperm.slane %v2045_v60, 0  ;;  %v833_v44 = vadd.f32 %v2846_v25, %v2584_v50 }
 0x214   : > { %v835_v40 = vadd.f32 %v2846_v25, %v2589_v56  ;;  %v838_v13 = vadd.f32 %v2846_v25, %v2593_v58 }
 0x215   : > { %1890 = vmatmul.msk.f32.gmra.mxu2 %vm1048_vm9, %v1340_v18  ;;  %v1347_v19 = vmul.f32 %v2733_v30, %v1335_v43  ;;  %v1348_v47 = vmul.f32 %v2737_v33, %v1335_v43  ;;  %v828_v30 = vadd.f32 %v2846_v25, %v2574_v37  ;;  %v830_v18 = vadd.f32 %v2846_v25, %v2580_v46 }
 0x216   : > { %v2051_v62 = vpop.eup %2050 }
 0x217   : > { %v1375_v53 = vrot.slane %v2051_v62, 1  ;;  %v1338_v51 = vperm.slane %v2051_v62, 0 }
 0x219   : > { %v1376_v38 = vsel %vm655_vm8, %v1375_v53, %v1374_v28  ;;  %v1353_v57 = vmul.f32 %v2784_v9, %v1338_v51  ;;  %v1354_v59 = vmul.f32 %v2786_v42, %v1338_v51  ;;  %v741_v9 = vpop.f32.mrf.mxu2 }
 0x21a   : > { %v1378_v31 = vmul.f32 %v2790_v21, %v1376_v38  ;;  %v742_v41 = vadd.f32 %v2846_v25, %v741_v9 }
 0x21c   : > { %1909 = vmatmul.msk.f32.vlgmr.msrb.gmra.mxu3 %vm1048_vm9, %v1378_v31 }
 0x21d   : > { %1891 = vmatmul.msk.f32.gmra.mxu2 %vm1048_vm9, %v1341_v7 }
 0x221   : > { %v743_v42 = vpop.f32.mrf.mxu2 }
 0x225   : > { %1892 = vmatmul.msk.f32.gmra.mxu2 %vm1048_vm9, %v1342_v8 }
 0x22d   : > { %1893 = vmatmul.msk.f32.gmra.mxu2 %vm1048_vm9, %v1343_v16 }
 0x235   : > { %1894 = vmatmul.msk.f32.gmra.mxu2 %vm1048_vm9, %v1344_v23 }
 0x23d   : > { %1895 = vmatmul.msk.f32.gmra.mxu2 %vm1048_vm9, %v1345_v6 }
 0x245   : > { %1896 = vmatmul.msk.f32.gmra.mxu2 %vm1048_vm9, %v1346_v11 }
 0x24d   : > { %1897 = vmatmul.msk.f32.gmra.mxu2 %vm1048_vm9, %v1347_v19  ;;  %v843_v19 = vadd.f32 %v2846_v25, %v2602_v3 }
 0x255   : > { %1898 = vmatmul.msk.f32.gmra.mxu2 %vm1048_vm9, %v1348_v47 }
 0x25d   : > { %1899 = vmatmul.msk.f32.gmra.mxu2 %vm1048_vm9, %v1349_v20 }
 0x265   : > { %1900 = vmatmul.msk.f32.gmra.mxu2 %vm1048_vm9, %v1350_v52  ;;  %v840_v52 = vadd.f32 %v2846_v25, %v2598_v24 }
 0x26d   : > { %1901 = vmatmul.msk.f32.gmra.mxu2 %vm1048_vm9, %v1351_v1 }
 0x275   : > { %1902 = vmatmul.msk.f32.gmra.mxu2 %vm1048_vm9, %v1352_v36 }
 0x27d   : > { %1903 = vmatmul.msk.f32.gmra.mxu2 %vm1048_vm9, %v1353_v57 }
 0x285   : > { %1904 = vmatmul.msk.f32.gmra.mxu2 %vm1048_vm9, %v1354_v59 }
 0x290   : > { %v1456_v33 = vpop.f32.mrf.mxu2 }
 0x291   : > { %v1527_v21 = vmul.f32 %v1456_v33, %v828_v30 }
 0x293   : > { %v1543_v12 = vsel %vm473_vm0, %v1527_v21, 0.0 }
 0x298   : > { %v1459_v2 = vpop.f32.mrf.mxu2 }
 0x299   : > { %v1528_v63 = vmul.f32 %v1459_v2, %v830_v18 }
 0x29b   : > { %v1544_v49 = vsel %vm473_vm0, %v1528_v63, 0.0  ;;  %v845_v63 = vadd.f32 %v2846_v25, %v2607_v34 }
 0x29c   : > { %v1545_v61 = vadd.f32 %v1544_v49, %v1543_v12 }
 0x29e   : > { %v1546_v60 = vrot.slane %v1545_v61, 4 }
 0x29f   : > { %v1524_v14 = vpop.f32.mrf.mxu3 }
 0x2a0   : > { %v1547_v22 = vadd.f32 %v1546_v60, %v1545_v61  ;;  %v1462_v7 = vpop.f32.mrf.mxu2  ;;  %v2859_v32 = vmul.f32 %v1524_v14, %v742_v41 }
 0x2a1   : > { %v1529_v8 = vmul.f32 %v1462_v7, %v833_v44 }
 0x2a2   : > { %v1548_v37 = vrot.slane %v1547_v22, 2  ;;  %v1617_v36 = vrot.slane %v2859_v32, 1  ;;  %v1618_v49 = vrot.slane %v2859_v32, 2 }
 0x2a3   : > { %v1552_v50 = vsel %vm473_vm0, %v1529_v8, 0.0 }
 0x2a4   : > { %v1549_v15 = vadd.f32 %v1548_v37, %v1547_v22 }
 0x2a6   : > { %v1550_v46 = vrot.slane %v1549_v15, 1 }
 0x2a8   : > { %v1551_v16 = vadd.f32 %v1550_v46, %v1549_v15  ;;  %v1465_v29 = vpop.f32.mrf.mxu2 }
 0x2a9   : > { %v1530_v54 = vmul.f32 %v1465_v29, %v835_v40  ;;  %v848_v29 = vadd.f32 %v2846_v25, %v2611_v35 }
 0x2aa   : > { %v1632_v23 = vadd.f32 %v2859_v32, %v1551_v16 }
 0x2ab   : > { %v1553_v0 = vsel %vm473_vm0, %v1530_v54, 0.0 }
 0x2ac   : > { %v1554_v27 = vadd.f32 %v1553_v0, %v1552_v50  ;;  %v1640_v58 = vpack.c.bf16 %v1632_v23, %v1632_v23  ;;  %v850_v23 = vadd.f32 %v2846_v25, %v2616_v10 }
 0x2ae   : > { %v1555_v55 = vrot.slane %v1554_v27, 4  ;;  %v1664_v47 = vunpack.c.l.b16 %v1640_v58 }
 0x2b0   : > { %v1556_v6 = vadd.f32 %v1555_v55, %v1554_v27  ;;  %v1468_v4 = vpop.f32.mrf.mxu2  ;;  %v1619_v27 = vrot.slane %v2859_v32, 3 }
 0x2b1   : > { %v1531_v28 = vmul.f32 %v1468_v4, %v838_v13 }
 0x2b2   : > { %v1557_v56 = vrot.slane %v1556_v6, 2 }
 0x2b3   : > { %v1561_v38 = vsel %vm473_vm0, %v1531_v28, 0.0 }
 0x2b4   : > { %v1558_v5 = vadd.f32 %v1557_v56, %v1556_v6 }
 0x2b6   : > { %v1559_v20 = vrot.slane %v1558_v5, 1 }
 0x2b8   : > { %v1560_v1 = vadd.f32 %v1559_v20, %v1558_v5  ;;  %v1471_v62 = vpop.f32.mrf.mxu2 }
 0x2b9   : > { %v1532_v53 = vmul.f32 %v1471_v62, %v840_v52 }
 0x2ba   : > { %v1633_v51 = vadd.f32 %v1617_v36, %v1560_v1 }
 0x2bb   : > { %v1562_v57 = vsel %vm473_vm0, %v1532_v53, 0.0 }
 0x2bc   : > { %v1641_v59 = vpack.c.bf16 %v1633_v51, %v1633_v51  ;;  %v1563_v31 = vadd.f32 %v1562_v57, %v1561_v38  ;;  %v853_v51 = vadd.f32 %v2846_v25, %v2621_v17  ;;  %v855_v57 = vadd.f32 %v2846_v25, %v2631_v26 }
 0x2be   : > { %v1665_v11 = vunpack.c.l.b16 %v1641_v59  ;;  %v1564_v43 = vrot.slane %v1563_v31, 4 }
 0x2c0   : > { %v1672_v24 = vrot.slane %v1665_v11, 7  ;;  %v1565_v9 = vadd.f32 %v1564_v43, %v1563_v31  ;;  %v1474_v42 = vpop.f32.mrf.mxu2  ;;  %v1620_v31 = vrot.slane %v2859_v32, 4 }
 0x2c1   : > { %v1533_v30 = vmul.f32 %v1474_v42, %v843_v19 }
 0x2c2   : > { %v1673_v33 = vsel %vm637_vm2, %v1672_v24, %v1664_v47  ;;  %v1566_v21 = vrot.slane %v1565_v9, 2 }
 0x2c3   : > { %v1570_v3 = vsel %vm473_vm0, %v1533_v30, 0.0 }
 0x2c4   : > { %v1567_v18 = vadd.f32 %v1566_v21, %v1565_v9 }
 0x2c6   : > { %v1568_v2 = vrot.slane %v1567_v18, 1 }
 0x2c8   : > { %v1569_v12 = vadd.f32 %v1568_v2, %v1567_v18  ;;  %v1477_v61 = vpop.f32.mrf.mxu2 }
 0x2c9   : > { %v1534_v60 = vmul.f32 %v1477_v61, %v845_v63  ;;  %v860_v61 = vadd.f32 %v2846_v25, %v2652_v45  ;;  %v1932_v45 = vld [vmem:[%s2968_s10 + $0x8] sm:$0xff] }
 0x2ca   : > { %v1634_v44 = vadd.f32 %v1618_v49, %v1569_v12  ;;  %v858_v12 = vadd.f32 %v2846_v25, %v2648_v39  ;;  %1708 = vmatpush.bf16.msra.mxu3 %v1932_v45 }
 0x2cb   : > { %v1571_v22 = vsel %vm473_vm0, %v1534_v60, 0.0 }
 0x2cc   : > { %v1642_v7 = vpack.c.bf16 %v1634_v44, %v1634_v44  ;;  %v1572_v8 = vadd.f32 %v1571_v22, %v1570_v3  ;;  %v1621_v3 = vrot.slane %v2859_v32, 5 }
 0x2ce   : > { %v1666_v37 = vunpack.c.l.b16 %v1642_v7  ;;  %v1573_v15 = vrot.slane %v1572_v8, 4 }
 0x2d0   : > { %v1674_v14 = vrot.slane %v1666_v37, 6  ;;  %v1574_v41 = vadd.f32 %v1573_v15, %v1572_v8  ;;  %v1480_v46 = vpop.f32.mrf.mxu2 }
 0x2d1   : > { %v1535_v50 = vmul.f32 %v1480_v46, %v848_v29 }
 0x2d2   : > { %v1675_v40 = vsel %vm640_vm3, %v1674_v14, %v1673_v33  ;;  %v1575_v34 = vrot.slane %v1574_v41, 2 }
 0x2d3   : > { %v1579_v4 = vsel %vm473_vm0, %v1535_v50, 0.0 }
 0x2d4   : > { %v1576_v16 = vadd.f32 %v1575_v34, %v1574_v41 }
 0x2d6   : > { %v1577_v54 = vrot.slane %v1576_v16, 1 }
 0x2d8   : > { %v1578_v0 = vadd.f32 %v1577_v54, %v1576_v16  ;;  %v1483_v55 = vpop.f32.mrf.mxu2  ;;  %v1931_v54 = vld [vmem:[%s2968_s10] sm:$0xff] }
 0x2d9   : > { %v1536_v13 = vmul.f32 %v1483_v55, %v850_v23  ;;  %1709 = vmatpush.bf16.msra.mxu3 %v1931_v54  ;;  %v2989_v55 = vld [vmem:[#allocation16_spill] sm:$0xff] }
 0x2da   : > { %v1635_v6 = vadd.f32 %v1619_v27, %v1578_v0  ;;  %v863_v0 = vadd.f32 %v2846_v25, %v2655_v48 }
 0x2db   : > { %v1580_v28 = vsel %vm473_vm0, %v1536_v13, 0.0  ;;  %v865_v13 = vadd.f32 %v2846_v25, %v2989_v55 }
 0x2dc   : > { %v1643_v56 = vpack.c.bf16 %v1635_v6, %v1635_v6  ;;  %v1581_v5 = vadd.f32 %v1580_v28, %v1579_v4  ;;  %v1622_v28 = vrot.slane %v2859_v32, 6 }
 0x2de   : > { %v1667_v20 = vunpack.c.l.b16 %v1643_v56  ;;  %v1582_v52 = vrot.slane %v1581_v5, 4 }
 0x2e0   : > { %v1676_v35 = vrot.slane %v1667_v20, 5  ;;  %v1583_v1 = vadd.f32 %v1582_v52, %v1581_v5  ;;  %v1486_v36 = vpop.f32.mrf.mxu2 }
 0x2e1   : > { %v1537_v58 = vmul.f32 %v1486_v36, %v853_v51 }
 0x2e2   : > { %v1677_v10 = vsel %vm643_vm4, %v1676_v35, %v1675_v40  ;;  %v1584_v62 = vrot.slane %v1583_v1, 2 }
 0x2e3   : > { %v1588_v47 = vsel %vm473_vm0, %v1537_v58, 0.0 }
 0x2e4   : > { %v1585_v53 = vadd.f32 %v1584_v62, %v1583_v1 }
 0x2e6   : > { %v1586_v38 = vrot.slane %v1585_v53, 1 }
 0x2e8   : > { %v1587_v59 = vadd.f32 %v1586_v38, %v1585_v53  ;;  %v1489_v11 = vpop.f32.mrf.mxu2 }
 0x2e9   : > { %v1538_v43 = vmul.f32 %v1489_v11, %v855_v57 }
 0x2ea   : > { %v1636_v19 = vadd.f32 %v1620_v31, %v1587_v59  ;;  %v1623_v59 = vrot.slane %v2859_v32, 7  ;;  %v1999_v32 = vld [vmem:[%s2969_s11] ss:$0 sm:$0xff] }
 0x2eb   : > { %v1589_v24 = vsel %vm473_vm0, %v1538_v43, 0.0 }
 0x2ec   : > { %v1644_v9 = vpack.c.bf16 %v1636_v19, %v1636_v19  ;;  %v1590_v42 = vadd.f32 %v1589_v24, %v1588_v47 }
 0x2ee   : > { %v1668_v30 = vunpack.c.l.b16 %v1644_v9  ;;  %v1591_v33 = vrot.slane %v1590_v42, 4 }
 0x2f0   : > { %v1678_v17 = vrot.slane %v1668_v30, 4  ;;  %v1592_v21 = vadd.f32 %v1591_v33, %v1590_v42  ;;  %v1492_v18 = vpop.f32.mrf.mxu2 }
 0x2f1   : > { %v1539_v60 = vmul.f32 %v1492_v18, %v858_v12 }
 0x2f2   : > { %v1679_v26 = vsel %vm646_vm5, %v1678_v17, %v1677_v10  ;;  %v1593_v2 = vrot.slane %v1592_v21, 2 }
 0x2f3   : > { %v1597_v37 = vsel %vm473_vm0, %v1539_v60, 0.0 }
 0x2f4   : > { %v1594_v63 = vadd.f32 %v1593_v2, %v1592_v21 }
 0x2f6   : > { %v1595_v49 = vrot.slane %v1594_v63, 1 }
 0x2f8   : > { %v1596_v44 = vadd.f32 %v1595_v49, %v1594_v63  ;;  %v1495_v22 = vpop.f32.mrf.mxu2 }
 0x2f9   : > { %v1540_v7 = vmul.f32 %v1495_v22, %v860_v61 }
 0x2fa   : > { %v1637_v8 = vadd.f32 %v1621_v3, %v1596_v44 }
 0x2fb   : > { %v1598_v15 = vsel %vm473_vm0, %v1540_v7, 0.0 }
 0x2fc   : > { %v1645_v14 = vpack.c.bf16 %v1637_v8, %v1637_v8  ;;  %v1599_v41 = vadd.f32 %v1598_v15, %v1597_v37 }
 0x2fe   : > { %v1669_v46 = vunpack.c.l.b16 %v1645_v14  ;;  %v1600_v40 = vrot.slane %v1599_v41, 4 }
 0x300   : > { %v1680_v39 = vrot.slane %v1669_v46, 3  ;;  %v1601_v34 = vadd.f32 %v1600_v40, %v1599_v41  ;;  %v1498_v16 = vpop.f32.mrf.mxu2 }
 0x301   : > { %v1541_v6 = vmul.f32 %v1498_v16, %v863_v0 }
 0x302   : > { %v1602_v29 = vrot.slane %v1601_v34, 2  ;;  %v1681_v23 = vsel %vm649_vm6, %v1680_v39, %v1679_v26 }
 0x303   : > { %v1606_v52 = vsel %vm473_vm0, %v1541_v6, 0.0 }
 0x304   : > { %v1603_v50 = vadd.f32 %v1602_v29, %v1601_v34 }
 0x306   : > { %v1604_v27 = vrot.slane %v1603_v50, 1 }
 0x308   : > { %v1605_v4 = vadd.f32 %v1604_v27, %v1603_v50  ;;  %v1501_v56 = vpop.f32.mrf.mxu2 }
 0x309   : > { %v1542_v5 = vmul.f32 %v1501_v56, %v865_v13 }
 0x30a   : > { %v1638_v20 = vadd.f32 %v1622_v28, %v1605_v4 }
 0x30b   : > { %v1607_v35 = vsel %vm473_vm0, %v1542_v5, 0.0 }
 0x30c   : > { %v1646_v1 = vpack.c.bf16 %v1638_v20, %v1638_v20  ;;  %v1608_v36 = vadd.f32 %v1607_v35, %v1606_v52 }
 0x30e   : > { %v1670_v10 = vunpack.c.l.b16 %v1646_v1  ;;  %v1609_v48 = vrot.slane %v1608_v36, 4 }
 0x310   : > { %v1682_v62 = vrot.slane %v1670_v10, 2  ;;  %v1610_v53 = vadd.f32 %v1609_v48, %v1608_v36 }
 0x312   : > { %v1611_v25 = vrot.slane %v1610_v53, 2  ;;  %v1683_v51 = vsel %vm652_vm7, %v1682_v62, %v1681_v23 }
 0x314   : > { %v1612_v38 = vadd.f32 %v1611_v25, %v1610_v53 }
 0x316   : > { %v1613_v57 = vrot.slane %v1612_v38, 1 }
 0x318   : > { %v1614_v58 = vadd.f32 %v1613_v57, %v1612_v38 }
 0x31a   : > { %v1639_v31 = vadd.f32 %v1623_v59, %v1614_v58 }
 0x31c   : > { %v1647_v11 = vpack.c.bf16 %v1639_v31, %v1639_v31 }
 0x31e   : > { %v1671_v43 = vunpack.c.l.b16 %v1647_v11 }
 0x320   : > { %v1684_v19 = vrot.slane %v1671_v43, 1 }
 0x322   : > { %v1685_v47 = vsel %vm655_vm8, %v1684_v19, %v1683_v51 }
 0x323   : > { %v1686_v24 = vpack.c.b16 %v1685_v47, %v1685_v47 }
 0x325   : > { %1918 = vmatmul.msk.bf16.vlgmr.msra.gmra.mxu3 %vm473_vm0, %v1686_v24 }
 0x3a8   : > { %v1711_v9 = vpop.f32.mrf.mxu3 }
 0x3a9   : > { %v1712_v42 = vadd.f32 %v1999_v32, %v1711_v9 }
 0x3ab   : > { %1716 = vst.msk [vmem:[%s451_s21] sm:$0xff] %vm1715_vm10, %v1712_v42 }
 0x3ac   : > { %2139 = shalt.err (!%p2136_p10)
}
 0x3ad   : > { %1939 = dma.vmem_to_hbm [thread:$0]  (%p2322_p7), %s1731_s17, 128, %s1733_s23, %s1718_s25  }
 0x3b0   : > { %v1713_v30 = vpop.f32.mrf.mxu3 }
 0x3b1 PF: > { %s2990_s8 = sld [smem:[#allocation11_spill]]  ;;  %p2992_p12 = scmp.ge.s32.totalorder %s2182_s24, 2 }
 0x3b3   : > { %p1950_p13 = pnand %p2992_p12, %p2290_p6 }
 0x3b5   : > { %p1951_p0 = pneg %p1950_p13 }
 0x3b7   : > { %s1744_s16 = sand.u32 1, %s2990_s8  }
 0x3b8   : > { %s1745_s15 = scalar_lea.sflag [#allocation4], %s1744_s16 }
 0x3b9   : > { %2165 = dma.done.wait (%p1951_p0), %s1745_s15, 128  }
 0x3ba   : > { %2167 = vsyncadd (%p1951_p0), %s1745_s15, 4294967168  ;;  %s2993_s24 = sld [smem:[#allocation14_spill]]  ;;  %s2996_s21 = smov %s2174_s22 }
 0x3bb   : > { %s2994_s19 = sld [smem:[#allocation12_spill]] }
 0x3bc   : > { %s2995_s23 = sld [smem:[#allocation15_spill]] }
 0x3c0   : > { %p26_p3 = scmp.ge.s32.totalorder %s2993_s24, 4  }
 0x3c1   : > { %s2997_s22 = smov %s2994_s19 }
 0x3c2   :  { %28 = sbr.rel (!%p26_p3) target bundleno = 8 (0x8), region = 117 }
 0x3c7   :  { %1751 = vsyncpa [#allocation3], 1 }
 0x3c8   :  { %1753 = vsyncpa [#allocation3 + $0x1], 1 }
 0x3c9   :  { %1754 = vsyncpa [#allocation6], 1 }
 0x3ca   :  { %1755 = vsyncpa [#allocation4], 1 }
 0x3cb   :  { %1757 = vsyncpa [#allocation4 + $0x1], 1 }

</bundles_post_ra>
